<compile_context>
chip_gen: v7x
topology: tpu7x:2x2x1
jax: 0.10.0
libtpu: 0.0.40
codegen_flags: <defaults>
</compile_context>

<pallas_src>
import functools

import jax
import jax.numpy as jnp
import numpy as np
from jax.experimental import pallas as pl
from jax.experimental.pallas import tpu as pltpu

BN_EPS = 1e-5


def _sign(v):
    # matches torch.sign semantics (sign(0) == 0)
    return jnp.where(v > 0, 1.0, jnp.where(v < 0, -1.0, 0.0)).astype(v.dtype)


def _tap_masks(H, W):
    """(9, 1, H*W) f32: 1 where a 3x3 tap reads a valid pixel, 0 where it reads zero padding."""
    hh, ww = np.meshgrid(np.arange(H), np.arange(W), indexing="ij")
    masks = []
    for dy in range(3):
        for dx in range(3):
            oh, ow = dy - 1, dx - 1
            valid = ((hh + oh >= 0) & (hh + oh < H) &
                     (ww + ow >= 0) & (ww + ow < W))
            masks.append(valid.reshape(1, H * W))
    return jnp.asarray(np.stack(masks).astype(np.float32))


def basic_block_kernel(mask_ref, x_ref, w1_ref, w2_ref, bn1_ref, bn2_ref, o_ref,
                       *, H, W):
    # Per-grid-step blocks (one batch element per step):
    #   mask_ref: (9, 1, HW)     tap border-validity masks (shared by both convs)
    #   x_ref   : (1, Cin, HW)   lane-dense activations (C on sublanes, H*W on lanes)
    #   w*_ref  : (9, Cout, Cin) raw conv weights, one (Cout, Cin) matrix per 3x3 tap
    #   bn*_ref : (4, C, 1)      gamma, beta, running_mean, running_var
    #   o_ref   : (1, Cout, HW)
    HW = H * W
    masks = mask_ref[...]                                    # (9, 1, HW) f32

    def binary_conv3x3(act, w_ref):
        # BinarizeConv2d: sign(act) (*) sign(W), 3x3, padding=1, no bias.
        s = _sign(act)                                       # (Cin, HW) f32 in {-1, 0, +1}
        wb = _sign(w_ref[...]).astype(jnp.bfloat16)          # (9, Cout, Cin); exact in bf16
        cout = wb.shape[1]
        acc = jnp.zeros((cout, HW), jnp.float32)
        for dy in range(3):
            for dx in range(3):
                t = 3 * dy + dx
                off = (dy - 1) * W + (dx - 1)                # flat source offset of this tap
                if off == 0:                                 # centre tap: no shift, no border
                    tap = s
                else:
                    # rolled[f] = s[f + off]; the mask zeroes positions whose true
                    # source lies in the zero padding (or would wrap across rows).
                    rolled = pltpu.roll(s, shift=(-off) % HW, axis=1)
                    tap = rolled * masks[t]
                # channel contraction on the MXU, f32 accumulation
                acc = acc + jnp.dot(wb[t], tap.astype(jnp.bfloat16),
                                    preferred_element_type=jnp.float32)
        return acc

    def batchnorm(v, bn_ref):
        # eval-mode BatchNorm2d: (v - mean) * rsqrt(var + eps) * gamma + beta
        p = bn_ref[...]                                      # (4, C, 1)
        gamma, beta, mean, var = p[0], p[1], p[2], p[3]      # each (C, 1), broadcast over lanes
        return (v - mean) * jax.lax.rsqrt(var + BN_EPS) * gamma + beta

    # act1 / act2 (Hardtanh) are omitted: their only consumer is the following
    # binarized conv, and sign(clip(v, -1, 1)) == sign(v).
    out = batchnorm(binary_conv3x3(x_ref[0], w1_ref), bn1_ref)   # conv1 + bn1
    out = batchnorm(binary_conv3x3(out, w2_ref), bn2_ref)        # conv2 + bn2
    o_ref[0] = (out + x_ref[0]).astype(o_ref.dtype)              # skip connection (residual re-read)


@jax.jit
def basic_block_forward(x_nchw, w1_oihw, w2_oihw, bn1, bn2):
    """x: (N, C, H, W); w: (Cout, Cin, 3, 3) PyTorch layout; bn: (4, C) = gamma/beta/mean/var."""
    N, Cin, H, W = x_nchw.shape
    Cout = w1_oihw.shape[0]
    HW = H * W

    x_flat = x_nchw.reshape(N, Cin, HW)                          # lane-dense; pure reshape
    w1_k = jnp.transpose(w1_oihw, (2, 3, 0, 1)).reshape(9, Cout, Cin)
    w2_k = jnp.transpose(w2_oihw, (2, 3, 0, 1)).reshape(9, Cout, Cout)
    bn1_k = bn1.reshape(4, Cout, 1)
    bn2_k = bn2.reshape(4, Cout, 1)
    masks = _tap_masks(H, W)                                     # compile-time constant

    out_flat = pl.pallas_call(
        functools.partial(basic_block_kernel, H=H, W=W),
        out_shape=jax.ShapeDtypeStruct((N, Cout, HW), jnp.float32),
        grid=(N,),
        in_specs=[
            pl.BlockSpec((9, 1, HW), lambda n: (0, 0, 0)),        # tap masks (broadcast)
            pl.BlockSpec((1, Cin, HW), lambda n: (n, 0, 0)),      # x: one batch element / step
            pl.BlockSpec((9, Cout, Cin), lambda n: (0, 0, 0)),    # w1
            pl.BlockSpec((9, Cout, Cout), lambda n: (0, 0, 0)),   # w2
            pl.BlockSpec((4, Cout, 1), lambda n: (0, 0, 0)),      # bn1
            pl.BlockSpec((4, Cout, 1), lambda n: (0, 0, 0)),      # bn2
        ],
        out_specs=pl.BlockSpec((1, Cout, HW), lambda n: (n, 0, 0)),
        compiler_params=pltpu.CompilerParams(
            dimension_semantics=("parallel",)),                   # megacore split on v7x
    )(masks, x_flat, w1_k, w2_k, bn1_k, bn2_k)

    return out_flat.reshape(N, Cout, H, W)


def reference_forward(x, w1, w2, bn1, bn2):
    # Pure-JAX reference (NCHW), for correctness check only.
    def hardtanh(v):
        return jnp.clip(v, -1.0, 1.0)

    def bconv(v, w):
        return jax.lax.conv_general_dilated(
            _sign(v), _sign(w), window_strides=(1, 1),
            padding=((1, 1), (1, 1)),
            dimension_numbers=("NCHW", "OIHW", "NCHW"))

    def bn(v, p):
        g, b, m, var = (p[i][None, :, None, None] for i in range(4))
        return (v - m) * jax.lax.rsqrt(var + BN_EPS) * g + b

    residual = x
    out = bconv(hardtanh(x), w1)
    out = bn(out, bn1)
    out = hardtanh(out)
    out = bconv(out, w2)
    out = bn(out, bn2)
    return out + residual


if __name__ == "__main__":
    key = jax.random.PRNGKey(0)
    ks = jax.random.split(key, 11)

    N, C, H, W = 2, 8, 16, 16     # inplanes = planes = 8, stride = 1, downsample = None
    planes = 8

    x = jax.random.normal(ks[0], (N, C, H, W), jnp.float32)
    w1 = jax.random.normal(ks[1], (planes, C, 3, 3), jnp.float32) * 0.1
    w2 = jax.random.normal(ks[2], (planes, planes, 3, 3), jnp.float32) * 0.1
    bn1 = jnp.stack([
        jax.random.uniform(ks[3], (planes,), minval=0.5, maxval=1.5),   # gamma
        jax.random.normal(ks[4], (planes,)) * 0.1,                      # beta
        jax.random.normal(ks[5], (planes,)) * 0.1,                      # running_mean
        jax.random.uniform(ks[6], (planes,), minval=0.5, maxval=1.5),   # running_var
    ]).astype(jnp.float32)
    bn2 = jnp.stack([
        jax.random.uniform(ks[7], (planes,), minval=0.5, maxval=1.5),
        jax.random.normal(ks[8], (planes,)) * 0.1,
        jax.random.normal(ks[9], (planes,)) * 0.1,
        jax.random.uniform(ks[10], (planes,), minval=0.5, maxval=1.5),
    ]).astype(jnp.float32)

    out = basic_block_forward(x, w1, w2, bn1, bn2)
    out = jax.block_until_ready(out)

    ref = reference_forward(x, w1, w2, bn1, bn2)
    assert out.shape == (N, planes, H, W)
    assert jnp.allclose(out, ref, atol=1e-3, rtol=1e-3), float(jnp.max(jnp.abs(out - ref)))

    print("KERNEL_OK")
</pallas_src>

<mosaic_0001>
module attributes {stable_mosaic.version = 11 : i64} {
  func.func @basic_block_kernel(%arg0: i32, %arg1: memref<9x1x256xf32, #tpu.memory_space<vmem>>, %arg2: memref<1x8x256xf32, #tpu.memory_space<vmem>>, %arg3: memref<9x8x8xf32, #tpu.memory_space<vmem>>, %arg4: memref<9x8x8xf32, #tpu.memory_space<vmem>>, %arg5: memref<4x8x1xf32, #tpu.memory_space<vmem>>, %arg6: memref<4x8x1xf32, #tpu.memory_space<vmem>>, %arg7: memref<1x8x256xf32, #tpu.memory_space<vmem>>) attributes {dimension_semantics = [#tpu.dimension_semantics<parallel>], iteration_bounds = array<i64: 2>, scalar_prefetch = 0 : i64, scratch_operands = 0 : i64, tpu.core_type = #tpu.core_type<tc>, window_params = [{pipeline_mode = #tpu.pipeline_mode<synchronous>, transform_indices = @transform_0, window_bounds = array<i64: 9, 1, 256>}, {transform_indices = @transform_1, window_bounds = array<i64: 1, 8, 256>}, {pipeline_mode = #tpu.pipeline_mode<synchronous>, transform_indices = @transform_2, window_bounds = array<i64: 9, 8, 8>}, {pipeline_mode = #tpu.pipeline_mode<synchronous>, transform_indices = @transform_3, window_bounds = array<i64: 9, 8, 8>}, {pipeline_mode = #tpu.pipeline_mode<synchronous>, transform_indices = @transform_4, window_bounds = array<i64: 4, 8, 1>}, {pipeline_mode = #tpu.pipeline_mode<synchronous>, transform_indices = @transform_5, window_bounds = array<i64: 4, 8, 1>}, {transform_indices = @transform_6, window_bounds = array<i64: 1, 8, 256>}]} {
    %c0 = arith.constant 0 : index
    %c0_0 = arith.constant 0 : index
    %c0_1 = arith.constant 0 : index
    %0 = vector.load %arg1[%c0, %c0_0, %c0_1] : memref<9x1x256xf32, #tpu.memory_space<vmem>>, vector<9x1x256xf32>
    %c0_2 = arith.constant 0 : index
    %c0_3 = arith.constant 0 : index
    %c0_4 = arith.constant 0 : index
    %1 = vector.load %arg2[%c0_2, %c0_3, %c0_4] : memref<1x8x256xf32, #tpu.memory_space<vmem>>, vector<1x8x256xf32>
    %2 = vector.shape_cast %1 : vector<1x8x256xf32> to vector<8x256xf32>
    %cst = arith.constant 0.000000e+00 : f32
    %3 = vector.broadcast %cst : f32 to vector<8x256xf32>
    %4 = arith.cmpf ogt, %2, %3 : vector<8x256xf32>
    %cst_5 = arith.constant 0.000000e+00 : f32
    %5 = vector.broadcast %cst_5 : f32 to vector<8x256xf32>
    %6 = arith.cmpf olt, %2, %5 : vector<8x256xf32>
    %cst_6 = arith.constant -1.000000e+00 : f32
    %cst_7 = arith.constant 0.000000e+00 : f32
    %7 = vector.broadcast %cst_6 : f32 to vector<8x256xf32>
    %8 = vector.broadcast %cst_7 : f32 to vector<8x256xf32>
    %9 = arith.select %6, %7, %8 : vector<8x256xi1>, vector<8x256xf32>
    %cst_8 = arith.constant 1.000000e+00 : f32
    %10 = vector.broadcast %cst_8 : f32 to vector<8x256xf32>
    %11 = arith.select %4, %10, %9 : vector<8x256xi1>, vector<8x256xf32>
    %c0_9 = arith.constant 0 : index
    %c0_10 = arith.constant 0 : index
    %c0_11 = arith.constant 0 : index
    %12 = vector.load %arg3[%c0_9, %c0_10, %c0_11] : memref<9x8x8xf32, #tpu.memory_space<vmem>>, vector<9x8x8xf32>
    %cst_12 = arith.constant 0.000000e+00 : f32
    %13 = vector.broadcast %cst_12 : f32 to vector<9x8x8xf32>
    %14 = arith.cmpf ogt, %12, %13 : vector<9x8x8xf32>
    %cst_13 = arith.constant 0.000000e+00 : f32
    %15 = vector.broadcast %cst_13 : f32 to vector<9x8x8xf32>
    %16 = arith.cmpf olt, %12, %15 : vector<9x8x8xf32>
    %cst_14 = arith.constant -1.000000e+00 : f32
    %cst_15 = arith.constant 0.000000e+00 : f32
    %17 = vector.broadcast %cst_14 : f32 to vector<9x8x8xf32>
    %18 = vector.broadcast %cst_15 : f32 to vector<9x8x8xf32>
    %19 = arith.select %16, %17, %18 : vector<9x8x8xi1>, vector<9x8x8xf32>
    %cst_16 = arith.constant 1.000000e+00 : f32
    %20 = vector.broadcast %cst_16 : f32 to vector<9x8x8xf32>
    %21 = arith.select %14, %20, %19 : vector<9x8x8xi1>, vector<9x8x8xf32>
    %22 = arith.truncf %21 : vector<9x8x8xf32> to vector<9x8x8xbf16>
    %cst_17 = arith.constant 0.000000e+00 : f32
    %23 = vector.broadcast %cst_17 : f32 to vector<8x256xf32>
    %c17_i32 = arith.constant 17 : i32
    %24 = tpu.dynamic_rotate %11 by %c17_i32 dim 1 : vector<8x256xf32>, i32 -> vector<8x256xf32>
    %25 = vector.extract_strided_slice %0 {offsets = [0, 0, 0], sizes = [1, 1, 256], strides = [1, 1, 1]} : vector<9x1x256xf32> to vector<1x1x256xf32>
    %26 = vector.shape_cast %25 : vector<1x1x256xf32> to vector<1x256xf32>
    %27 = vector.broadcast %26 : vector<1x256xf32> to vector<8x256xf32>
    %28 = arith.mulf %24, %27 : vector<8x256xf32>
    %29 = vector.extract_strided_slice %22 {offsets = [0, 0, 0], sizes = [1, 8, 8], strides = [1, 1, 1]} : vector<9x8x8xbf16> to vector<1x8x8xbf16>
    %30 = vector.shape_cast %29 : vector<1x8x8xbf16> to vector<8x8xbf16>
    %31 = arith.truncf %28 : vector<8x256xf32> to vector<8x256xbf16>
    %cst_18 = arith.constant dense<0.000000e+00> : vector<8x256xf32>
    %32 = tpu.matmul %30, %31, %cst_18 {dimension_numbers = #tpu.dot_dimension_numbers<[1], [0], [0], [1], [0, 0, 1, 1], [], []>} : vector<8x8xbf16>, vector<8x256xbf16>, vector<8x256xf32> -> vector<8x256xf32>
    %33 = arith.addf %23, %32 : vector<8x256xf32>
    %c16_i32 = arith.constant 16 : i32
    %34 = tpu.dynamic_rotate %11 by %c16_i32 dim 1 : vector<8x256xf32>, i32 -> vector<8x256xf32>
    %35 = vector.extract_strided_slice %0 {offsets = [1, 0, 0], sizes = [1, 1, 256], strides = [1, 1, 1]} : vector<9x1x256xf32> to vector<1x1x256xf32>
    %36 = vector.shape_cast %35 : vector<1x1x256xf32> to vector<1x256xf32>
    %37 = vector.broadcast %36 : vector<1x256xf32> to vector<8x256xf32>
    %38 = arith.mulf %34, %37 : vector<8x256xf32>
    %39 = vector.extract_strided_slice %22 {offsets = [1, 0, 0], sizes = [1, 8, 8], strides = [1, 1, 1]} : vector<9x8x8xbf16> to vector<1x8x8xbf16>
    %40 = vector.shape_cast %39 : vector<1x8x8xbf16> to vector<8x8xbf16>
    %41 = arith.truncf %38 : vector<8x256xf32> to vector<8x256xbf16>
    %cst_19 = arith.constant dense<0.000000e+00> : vector<8x256xf32>
    %42 = tpu.matmul %40, %41, %cst_19 {dimension_numbers = #tpu.dot_dimension_numbers<[1], [0], [0], [1], [0, 0, 1, 1], [], []>} : vector<8x8xbf16>, vector<8x256xbf16>, vector<8x256xf32> -> vector<8x256xf32>
    %43 = arith.addf %33, %42 : vector<8x256xf32>
    %c15_i32 = arith.constant 15 : i32
    %44 = tpu.dynamic_rotate %11 by %c15_i32 dim 1 : vector<8x256xf32>, i32 -> vector<8x256xf32>
    %45 = vector.extract_strided_slice %0 {offsets = [2, 0, 0], sizes = [1, 1, 256], strides = [1, 1, 1]} : vector<9x1x256xf32> to vector<1x1x256xf32>
    %46 = vector.shape_cast %45 : vector<1x1x256xf32> to vector<1x256xf32>
    %47 = vector.broadcast %46 : vector<1x256xf32> to vector<8x256xf32>
    %48 = arith.mulf %44, %47 : vector<8x256xf32>
    %49 = vector.extract_strided_slice %22 {offsets = [2, 0, 0], sizes = [1, 8, 8], strides = [1, 1, 1]} : vector<9x8x8xbf16> to vector<1x8x8xbf16>
    %50 = vector.shape_cast %49 : vector<1x8x8xbf16> to vector<8x8xbf16>
    %51 = arith.truncf %48 : vector<8x256xf32> to vector<8x256xbf16>
    %cst_20 = arith.constant dense<0.000000e+00> : vector<8x256xf32>
    %52 = tpu.matmul %50, %51, %cst_20 {dimension_numbers = #tpu.dot_dimension_numbers<[1], [0], [0], [1], [0, 0, 1, 1], [], []>} : vector<8x8xbf16>, vector<8x256xbf16>, vector<8x256xf32> -> vector<8x256xf32>
    %53 = arith.addf %43, %52 : vector<8x256xf32>
    %c1_i32 = arith.constant 1 : i32
    %54 = tpu.dynamic_rotate %11 by %c1_i32 dim 1 : vector<8x256xf32>, i32 -> vector<8x256xf32>
    %55 = vector.extract_strided_slice %0 {offsets = [3, 0, 0], sizes = [1, 1, 256], strides = [1, 1, 1]} : vector<9x1x256xf32> to vector<1x1x256xf32>
    %56 = vector.shape_cast %55 : vector<1x1x256xf32> to vector<1x256xf32>
    %57 = vector.broadcast %56 : vector<1x256xf32> to vector<8x256xf32>
    %58 = arith.mulf %54, %57 : vector<8x256xf32>
    %59 = vector.extract_strided_slice %22 {offsets = [3, 0, 0], sizes = [1, 8, 8], strides = [1, 1, 1]} : vector<9x8x8xbf16> to vector<1x8x8xbf16>
    %60 = vector.shape_cast %59 : vector<1x8x8xbf16> to vector<8x8xbf16>
    %61 = arith.truncf %58 : vector<8x256xf32> to vector<8x256xbf16>
    %cst_21 = arith.constant dense<0.000000e+00> : vector<8x256xf32>
    %62 = tpu.matmul %60, %61, %cst_21 {dimension_numbers = #tpu.dot_dimension_numbers<[1], [0], [0], [1], [0, 0, 1, 1], [], []>} : vector<8x8xbf16>, vector<8x256xbf16>, vector<8x256xf32> -> vector<8x256xf32>
    %63 = arith.addf %53, %62 : vector<8x256xf32>
    %64 = vector.extract_strided_slice %22 {offsets = [4, 0, 0], sizes = [1, 8, 8], strides = [1, 1, 1]} : vector<9x8x8xbf16> to vector<1x8x8xbf16>
    %65 = vector.shape_cast %64 : vector<1x8x8xbf16> to vector<8x8xbf16>
    %66 = arith.truncf %11 : vector<8x256xf32> to vector<8x256xbf16>
    %cst_22 = arith.constant dense<0.000000e+00> : vector<8x256xf32>
    %67 = tpu.matmul %65, %66, %cst_22 {dimension_numbers = #tpu.dot_dimension_numbers<[1], [0], [0], [1], [0, 0, 1, 1], [], []>} : vector<8x8xbf16>, vector<8x256xbf16>, vector<8x256xf32> -> vector<8x256xf32>
    %68 = arith.addf %63, %67 : vector<8x256xf32>
    %c255_i32 = arith.constant 255 : i32
    %69 = tpu.dynamic_rotate %11 by %c255_i32 dim 1 : vector<8x256xf32>, i32 -> vector<8x256xf32>
    %70 = vector.extract_strided_slice %0 {offsets = [5, 0, 0], sizes = [1, 1, 256], strides = [1, 1, 1]} : vector<9x1x256xf32> to vector<1x1x256xf32>
    %71 = vector.shape_cast %70 : vector<1x1x256xf32> to vector<1x256xf32>
    %72 = vector.broadcast %71 : vector<1x256xf32> to vector<8x256xf32>
    %73 = arith.mulf %69, %72 : vector<8x256xf32>
    %74 = vector.extract_strided_slice %22 {offsets = [5, 0, 0], sizes = [1, 8, 8], strides = [1, 1, 1]} : vector<9x8x8xbf16> to vector<1x8x8xbf16>
    %75 = vector.shape_cast %74 : vector<1x8x8xbf16> to vector<8x8xbf16>
    %76 = arith.truncf %73 : vector<8x256xf32> to vector<8x256xbf16>
    %cst_23 = arith.constant dense<0.000000e+00> : vector<8x256xf32>
    %77 = tpu.matmul %75, %76, %cst_23 {dimension_numbers = #tpu.dot_dimension_numbers<[1], [0], [0], [1], [0, 0, 1, 1], [], []>} : vector<8x8xbf16>, vector<8x256xbf16>, vector<8x256xf32> -> vector<8x256xf32>
    %78 = arith.addf %68, %77 : vector<8x256xf32>
    %c241_i32 = arith.constant 241 : i32
    %79 = tpu.dynamic_rotate %11 by %c241_i32 dim 1 : vector<8x256xf32>, i32 -> vector<8x256xf32>
    %80 = vector.extract_strided_slice %0 {offsets = [6, 0, 0], sizes = [1, 1, 256], strides = [1, 1, 1]} : vector<9x1x256xf32> to vector<1x1x256xf32>
    %81 = vector.shape_cast %80 : vector<1x1x256xf32> to vector<1x256xf32>
    %82 = vector.broadcast %81 : vector<1x256xf32> to vector<8x256xf32>
    %83 = arith.mulf %79, %82 : vector<8x256xf32>
    %84 = vector.extract_strided_slice %22 {offsets = [6, 0, 0], sizes = [1, 8, 8], strides = [1, 1, 1]} : vector<9x8x8xbf16> to vector<1x8x8xbf16>
    %85 = vector.shape_cast %84 : vector<1x8x8xbf16> to vector<8x8xbf16>
    %86 = arith.truncf %83 : vector<8x256xf32> to vector<8x256xbf16>
    %cst_24 = arith.constant dense<0.000000e+00> : vector<8x256xf32>
    %87 = tpu.matmul %85, %86, %cst_24 {dimension_numbers = #tpu.dot_dimension_numbers<[1], [0], [0], [1], [0, 0, 1, 1], [], []>} : vector<8x8xbf16>, vector<8x256xbf16>, vector<8x256xf32> -> vector<8x256xf32>
    %88 = arith.addf %78, %87 : vector<8x256xf32>
    %c240_i32 = arith.constant 240 : i32
    %89 = tpu.dynamic_rotate %11 by %c240_i32 dim 1 : vector<8x256xf32>, i32 -> vector<8x256xf32>
    %90 = vector.extract_strided_slice %0 {offsets = [7, 0, 0], sizes = [1, 1, 256], strides = [1, 1, 1]} : vector<9x1x256xf32> to vector<1x1x256xf32>
    %91 = vector.shape_cast %90 : vector<1x1x256xf32> to vector<1x256xf32>
    %92 = vector.broadcast %91 : vector<1x256xf32> to vector<8x256xf32>
    %93 = arith.mulf %89, %92 : vector<8x256xf32>
    %94 = vector.extract_strided_slice %22 {offsets = [7, 0, 0], sizes = [1, 8, 8], strides = [1, 1, 1]} : vector<9x8x8xbf16> to vector<1x8x8xbf16>
    %95 = vector.shape_cast %94 : vector<1x8x8xbf16> to vector<8x8xbf16>
    %96 = arith.truncf %93 : vector<8x256xf32> to vector<8x256xbf16>
    %cst_25 = arith.constant dense<0.000000e+00> : vector<8x256xf32>
    %97 = tpu.matmul %95, %96, %cst_25 {dimension_numbers = #tpu.dot_dimension_numbers<[1], [0], [0], [1], [0, 0, 1, 1], [], []>} : vector<8x8xbf16>, vector<8x256xbf16>, vector<8x256xf32> -> vector<8x256xf32>
    %98 = arith.addf %88, %97 : vector<8x256xf32>
    %c239_i32 = arith.constant 239 : i32
    %99 = tpu.dynamic_rotate %11 by %c239_i32 dim 1 : vector<8x256xf32>, i32 -> vector<8x256xf32>
    %100 = vector.extract_strided_slice %0 {offsets = [8, 0, 0], sizes = [1, 1, 256], strides = [1, 1, 1]} : vector<9x1x256xf32> to vector<1x1x256xf32>
    %101 = vector.shape_cast %100 : vector<1x1x256xf32> to vector<1x256xf32>
    %102 = vector.broadcast %101 : vector<1x256xf32> to vector<8x256xf32>
    %103 = arith.mulf %99, %102 : vector<8x256xf32>
    %104 = vector.extract_strided_slice %22 {offsets = [8, 0, 0], sizes = [1, 8, 8], strides = [1, 1, 1]} : vector<9x8x8xbf16> to vector<1x8x8xbf16>
    %105 = vector.shape_cast %104 : vector<1x8x8xbf16> to vector<8x8xbf16>
    %106 = arith.truncf %103 : vector<8x256xf32> to vector<8x256xbf16>
    %cst_26 = arith.constant dense<0.000000e+00> : vector<8x256xf32>
    %107 = tpu.matmul %105, %106, %cst_26 {dimension_numbers = #tpu.dot_dimension_numbers<[1], [0], [0], [1], [0, 0, 1, 1], [], []>} : vector<8x8xbf16>, vector<8x256xbf16>, vector<8x256xf32> -> vector<8x256xf32>
    %108 = arith.addf %98, %107 : vector<8x256xf32>
    %c0_27 = arith.constant 0 : index
    %c0_28 = arith.constant 0 : index
    %c0_29 = arith.constant 0 : index
    %109 = vector.load %arg5[%c0_27, %c0_28, %c0_29] : memref<4x8x1xf32, #tpu.memory_space<vmem>>, vector<4x8x1xf32>
    %110 = vector.extract_strided_slice %109 {offsets = [0, 0, 0], sizes = [1, 8, 1], strides = [1, 1, 1]} : vector<4x8x1xf32> to vector<1x8x1xf32>
    %111 = vector.shape_cast %110 : vector<1x8x1xf32> to vector<8x1xf32>
    %112 = vector.extract_strided_slice %109 {offsets = [1, 0, 0], sizes = [1, 8, 1], strides = [1, 1, 1]} : vector<4x8x1xf32> to vector<1x8x1xf32>
    %113 = vector.shape_cast %112 : vector<1x8x1xf32> to vector<8x1xf32>
    %114 = vector.extract_strided_slice %109 {offsets = [2, 0, 0], sizes = [1, 8, 1], strides = [1, 1, 1]} : vector<4x8x1xf32> to vector<1x8x1xf32>
    %115 = vector.shape_cast %114 : vector<1x8x1xf32> to vector<8x1xf32>
    %116 = vector.extract_strided_slice %109 {offsets = [3, 0, 0], sizes = [1, 8, 1], strides = [1, 1, 1]} : vector<4x8x1xf32> to vector<1x8x1xf32>
    %117 = vector.shape_cast %116 : vector<1x8x1xf32> to vector<8x1xf32>
    %118 = vector.broadcast %115 : vector<8x1xf32> to vector<8x256xf32>
    %119 = arith.subf %108, %118 : vector<8x256xf32>
    %cst_30 = arith.constant 9.99999974E-6 : f32
    %120 = vector.broadcast %cst_30 : f32 to vector<8x1xf32>
    %121 = arith.addf %117, %120 : vector<8x1xf32>
    %122 = math.rsqrt %121 : vector<8x1xf32>
    %123 = vector.broadcast %122 : vector<8x1xf32> to vector<8x256xf32>
    %124 = arith.mulf %119, %123 : vector<8x256xf32>
    %125 = vector.broadcast %111 : vector<8x1xf32> to vector<8x256xf32>
    %126 = arith.mulf %124, %125 : vector<8x256xf32>
    %127 = vector.broadcast %113 : vector<8x1xf32> to vector<8x256xf32>
    %128 = arith.addf %126, %127 : vector<8x256xf32>
    %cst_31 = arith.constant 0.000000e+00 : f32
    %129 = vector.broadcast %cst_31 : f32 to vector<8x256xf32>
    %130 = arith.cmpf ogt, %128, %129 : vector<8x256xf32>
    %cst_32 = arith.constant 0.000000e+00 : f32
    %131 = vector.broadcast %cst_32 : f32 to vector<8x256xf32>
    %132 = arith.cmpf olt, %128, %131 : vector<8x256xf32>
    %cst_33 = arith.constant -1.000000e+00 : f32
    %cst_34 = arith.constant 0.000000e+00 : f32
    %133 = vector.broadcast %cst_33 : f32 to vector<8x256xf32>
    %134 = vector.broadcast %cst_34 : f32 to vector<8x256xf32>
    %135 = arith.select %132, %133, %134 : vector<8x256xi1>, vector<8x256xf32>
    %cst_35 = arith.constant 1.000000e+00 : f32
    %136 = vector.broadcast %cst_35 : f32 to vector<8x256xf32>
    %137 = arith.select %130, %136, %135 : vector<8x256xi1>, vector<8x256xf32>
    %c0_36 = arith.constant 0 : index
    %c0_37 = arith.constant 0 : index
    %c0_38 = arith.constant 0 : index
    %138 = vector.load %arg4[%c0_36, %c0_37, %c0_38] : memref<9x8x8xf32, #tpu.memory_space<vmem>>, vector<9x8x8xf32>
    %cst_39 = arith.constant 0.000000e+00 : f32
    %139 = vector.broadcast %cst_39 : f32 to vector<9x8x8xf32>
    %140 = arith.cmpf ogt, %138, %139 : vector<9x8x8xf32>
    %cst_40 = arith.constant 0.000000e+00 : f32
    %141 = vector.broadcast %cst_40 : f32 to vector<9x8x8xf32>
    %142 = arith.cmpf olt, %138, %141 : vector<9x8x8xf32>
    %cst_41 = arith.constant -1.000000e+00 : f32
    %cst_42 = arith.constant 0.000000e+00 : f32
    %143 = vector.broadcast %cst_41 : f32 to vector<9x8x8xf32>
    %144 = vector.broadcast %cst_42 : f32 to vector<9x8x8xf32>
    %145 = arith.select %142, %143, %144 : vector<9x8x8xi1>, vector<9x8x8xf32>
    %cst_43 = arith.constant 1.000000e+00 : f32
    %146 = vector.broadcast %cst_43 : f32 to vector<9x8x8xf32>
    %147 = arith.select %140, %146, %145 : vector<9x8x8xi1>, vector<9x8x8xf32>
    %148 = arith.truncf %147 : vector<9x8x8xf32> to vector<9x8x8xbf16>
    %cst_44 = arith.constant 0.000000e+00 : f32
    %149 = vector.broadcast %cst_44 : f32 to vector<8x256xf32>
    %c17_i32_45 = arith.constant 17 : i32
    %150 = tpu.dynamic_rotate %137 by %c17_i32_45 dim 1 : vector<8x256xf32>, i32 -> vector<8x256xf32>
    %151 = vector.extract_strided_slice %0 {offsets = [0, 0, 0], sizes = [1, 1, 256], strides = [1, 1, 1]} : vector<9x1x256xf32> to vector<1x1x256xf32>
    %152 = vector.shape_cast %151 : vector<1x1x256xf32> to vector<1x256xf32>
    %153 = vector.broadcast %152 : vector<1x256xf32> to vector<8x256xf32>
    %154 = arith.mulf %150, %153 : vector<8x256xf32>
    %155 = vector.extract_strided_slice %148 {offsets = [0, 0, 0], sizes = [1, 8, 8], strides = [1, 1, 1]} : vector<9x8x8xbf16> to vector<1x8x8xbf16>
    %156 = vector.shape_cast %155 : vector<1x8x8xbf16> to vector<8x8xbf16>
    %157 = arith.truncf %154 : vector<8x256xf32> to vector<8x256xbf16>
    %cst_46 = arith.constant dense<0.000000e+00> : vector<8x256xf32>
    %158 = tpu.matmul %156, %157, %cst_46 {dimension_numbers = #tpu.dot_dimension_numbers<[1], [0], [0], [1], [0, 0, 1, 1], [], []>} : vector<8x8xbf16>, vector<8x256xbf16>, vector<8x256xf32> -> vector<8x256xf32>
    %159 = arith.addf %149, %158 : vector<8x256xf32>
    %c16_i32_47 = arith.constant 16 : i32
    %160 = tpu.dynamic_rotate %137 by %c16_i32_47 dim 1 : vector<8x256xf32>, i32 -> vector<8x256xf32>
    %161 = vector.extract_strided_slice %0 {offsets = [1, 0, 0], sizes = [1, 1, 256], strides = [1, 1, 1]} : vector<9x1x256xf32> to vector<1x1x256xf32>
    %162 = vector.shape_cast %161 : vector<1x1x256xf32> to vector<1x256xf32>
    %163 = vector.broadcast %162 : vector<1x256xf32> to vector<8x256xf32>
    %164 = arith.mulf %160, %163 : vector<8x256xf32>
    %165 = vector.extract_strided_slice %148 {offsets = [1, 0, 0], sizes = [1, 8, 8], strides = [1, 1, 1]} : vector<9x8x8xbf16> to vector<1x8x8xbf16>
    %166 = vector.shape_cast %165 : vector<1x8x8xbf16> to vector<8x8xbf16>
    %167 = arith.truncf %164 : vector<8x256xf32> to vector<8x256xbf16>
    %cst_48 = arith.constant dense<0.000000e+00> : vector<8x256xf32>
    %168 = tpu.matmul %166, %167, %cst_48 {dimension_numbers = #tpu.dot_dimension_numbers<[1], [0], [0], [1], [0, 0, 1, 1], [], []>} : vector<8x8xbf16>, vector<8x256xbf16>, vector<8x256xf32> -> vector<8x256xf32>
    %169 = arith.addf %159, %168 : vector<8x256xf32>
    %c15_i32_49 = arith.constant 15 : i32
    %170 = tpu.dynamic_rotate %137 by %c15_i32_49 dim 1 : vector<8x256xf32>, i32 -> vector<8x256xf32>
    %171 = vector.extract_strided_slice %0 {offsets = [2, 0, 0], sizes = [1, 1, 256], strides = [1, 1, 1]} : vector<9x1x256xf32> to vector<1x1x256xf32>
    %172 = vector.shape_cast %171 : vector<1x1x256xf32> to vector<1x256xf32>
    %173 = vector.broadcast %172 : vector<1x256xf32> to vector<8x256xf32>
    %174 = arith.mulf %170, %173 : vector<8x256xf32>
    %175 = vector.extract_strided_slice %148 {offsets = [2, 0, 0], sizes = [1, 8, 8], strides = [1, 1, 1]} : vector<9x8x8xbf16> to vector<1x8x8xbf16>
    %176 = vector.shape_cast %175 : vector<1x8x8xbf16> to vector<8x8xbf16>
    %177 = arith.truncf %174 : vector<8x256xf32> to vector<8x256xbf16>
    %cst_50 = arith.constant dense<0.000000e+00> : vector<8x256xf32>
    %178 = tpu.matmul %176, %177, %cst_50 {dimension_numbers = #tpu.dot_dimension_numbers<[1], [0], [0], [1], [0, 0, 1, 1], [], []>} : vector<8x8xbf16>, vector<8x256xbf16>, vector<8x256xf32> -> vector<8x256xf32>
    %179 = arith.addf %169, %178 : vector<8x256xf32>
    %c1_i32_51 = arith.constant 1 : i32
    %180 = tpu.dynamic_rotate %137 by %c1_i32_51 dim 1 : vector<8x256xf32>, i32 -> vector<8x256xf32>
    %181 = vector.extract_strided_slice %0 {offsets = [3, 0, 0], sizes = [1, 1, 256], strides = [1, 1, 1]} : vector<9x1x256xf32> to vector<1x1x256xf32>
    %182 = vector.shape_cast %181 : vector<1x1x256xf32> to vector<1x256xf32>
    %183 = vector.broadcast %182 : vector<1x256xf32> to vector<8x256xf32>
    %184 = arith.mulf %180, %183 : vector<8x256xf32>
    %185 = vector.extract_strided_slice %148 {offsets = [3, 0, 0], sizes = [1, 8, 8], strides = [1, 1, 1]} : vector<9x8x8xbf16> to vector<1x8x8xbf16>
    %186 = vector.shape_cast %185 : vector<1x8x8xbf16> to vector<8x8xbf16>
    %187 = arith.truncf %184 : vector<8x256xf32> to vector<8x256xbf16>
    %cst_52 = arith.constant dense<0.000000e+00> : vector<8x256xf32>
    %188 = tpu.matmul %186, %187, %cst_52 {dimension_numbers = #tpu.dot_dimension_numbers<[1], [0], [0], [1], [0, 0, 1, 1], [], []>} : vector<8x8xbf16>, vector<8x256xbf16>, vector<8x256xf32> -> vector<8x256xf32>
    %189 = arith.addf %179, %188 : vector<8x256xf32>
    %190 = vector.extract_strided_slice %148 {offsets = [4, 0, 0], sizes = [1, 8, 8], strides = [1, 1, 1]} : vector<9x8x8xbf16> to vector<1x8x8xbf16>
    %191 = vector.shape_cast %190 : vector<1x8x8xbf16> to vector<8x8xbf16>
    %192 = arith.truncf %137 : vector<8x256xf32> to vector<8x256xbf16>
    %cst_53 = arith.constant dense<0.000000e+00> : vector<8x256xf32>
    %193 = tpu.matmul %191, %192, %cst_53 {dimension_numbers = #tpu.dot_dimension_numbers<[1], [0], [0], [1], [0, 0, 1, 1], [], []>} : vector<8x8xbf16>, vector<8x256xbf16>, vector<8x256xf32> -> vector<8x256xf32>
    %194 = arith.addf %189, %193 : vector<8x256xf32>
    %c255_i32_54 = arith.constant 255 : i32
    %195 = tpu.dynamic_rotate %137 by %c255_i32_54 dim 1 : vector<8x256xf32>, i32 -> vector<8x256xf32>
    %196 = vector.extract_strided_slice %0 {offsets = [5, 0, 0], sizes = [1, 1, 256], strides = [1, 1, 1]} : vector<9x1x256xf32> to vector<1x1x256xf32>
    %197 = vector.shape_cast %196 : vector<1x1x256xf32> to vector<1x256xf32>
    %198 = vector.broadcast %197 : vector<1x256xf32> to vector<8x256xf32>
    %199 = arith.mulf %195, %198 : vector<8x256xf32>
    %200 = vector.extract_strided_slice %148 {offsets = [5, 0, 0], sizes = [1, 8, 8], strides = [1, 1, 1]} : vector<9x8x8xbf16> to vector<1x8x8xbf16>
    %201 = vector.shape_cast %200 : vector<1x8x8xbf16> to vector<8x8xbf16>
    %202 = arith.truncf %199 : vector<8x256xf32> to vector<8x256xbf16>
    %cst_55 = arith.constant dense<0.000000e+00> : vector<8x256xf32>
    %203 = tpu.matmul %201, %202, %cst_55 {dimension_numbers = #tpu.dot_dimension_numbers<[1], [0], [0], [1], [0, 0, 1, 1], [], []>} : vector<8x8xbf16>, vector<8x256xbf16>, vector<8x256xf32> -> vector<8x256xf32>
    %204 = arith.addf %194, %203 : vector<8x256xf32>
    %c241_i32_56 = arith.constant 241 : i32
    %205 = tpu.dynamic_rotate %137 by %c241_i32_56 dim 1 : vector<8x256xf32>, i32 -> vector<8x256xf32>
    %206 = vector.extract_strided_slice %0 {offsets = [6, 0, 0], sizes = [1, 1, 256], strides = [1, 1, 1]} : vector<9x1x256xf32> to vector<1x1x256xf32>
    %207 = vector.shape_cast %206 : vector<1x1x256xf32> to vector<1x256xf32>
    %208 = vector.broadcast %207 : vector<1x256xf32> to vector<8x256xf32>
    %209 = arith.mulf %205, %208 : vector<8x256xf32>
    %210 = vector.extract_strided_slice %148 {offsets = [6, 0, 0], sizes = [1, 8, 8], strides = [1, 1, 1]} : vector<9x8x8xbf16> to vector<1x8x8xbf16>
    %211 = vector.shape_cast %210 : vector<1x8x8xbf16> to vector<8x8xbf16>
    %212 = arith.truncf %209 : vector<8x256xf32> to vector<8x256xbf16>
    %cst_57 = arith.constant dense<0.000000e+00> : vector<8x256xf32>
    %213 = tpu.matmul %211, %212, %cst_57 {dimension_numbers = #tpu.dot_dimension_numbers<[1], [0], [0], [1], [0, 0, 1, 1], [], []>} : vector<8x8xbf16>, vector<8x256xbf16>, vector<8x256xf32> -> vector<8x256xf32>
    %214 = arith.addf %204, %213 : vector<8x256xf32>
    %c240_i32_58 = arith.constant 240 : i32
    %215 = tpu.dynamic_rotate %137 by %c240_i32_58 dim 1 : vector<8x256xf32>, i32 -> vector<8x256xf32>
    %216 = vector.extract_strided_slice %0 {offsets = [7, 0, 0], sizes = [1, 1, 256], strides = [1, 1, 1]} : vector<9x1x256xf32> to vector<1x1x256xf32>
    %217 = vector.shape_cast %216 : vector<1x1x256xf32> to vector<1x256xf32>
    %218 = vector.broadcast %217 : vector<1x256xf32> to vector<8x256xf32>
    %219 = arith.mulf %215, %218 : vector<8x256xf32>
    %220 = vector.extract_strided_slice %148 {offsets = [7, 0, 0], sizes = [1, 8, 8], strides = [1, 1, 1]} : vector<9x8x8xbf16> to vector<1x8x8xbf16>
    %221 = vector.shape_cast %220 : vector<1x8x8xbf16> to vector<8x8xbf16>
    %222 = arith.truncf %219 : vector<8x256xf32> to vector<8x256xbf16>
    %cst_59 = arith.constant dense<0.000000e+00> : vector<8x256xf32>
    %223 = tpu.matmul %221, %222, %cst_59 {dimension_numbers = #tpu.dot_dimension_numbers<[1], [0], [0], [1], [0, 0, 1, 1], [], []>} : vector<8x8xbf16>, vector<8x256xbf16>, vector<8x256xf32> -> vector<8x256xf32>
    %224 = arith.addf %214, %223 : vector<8x256xf32>
    %c239_i32_60 = arith.constant 239 : i32
    %225 = tpu.dynamic_rotate %137 by %c239_i32_60 dim 1 : vector<8x256xf32>, i32 -> vector<8x256xf32>
    %226 = vector.extract_strided_slice %0 {offsets = [8, 0, 0], sizes = [1, 1, 256], strides = [1, 1, 1]} : vector<9x1x256xf32> to vector<1x1x256xf32>
    %227 = vector.shape_cast %226 : vector<1x1x256xf32> to vector<1x256xf32>
    %228 = vector.broadcast %227 : vector<1x256xf32> to vector<8x256xf32>
    %229 = arith.mulf %225, %228 : vector<8x256xf32>
    %230 = vector.extract_strided_slice %148 {offsets = [8, 0, 0], sizes = [1, 8, 8], strides = [1, 1, 1]} : vector<9x8x8xbf16> to vector<1x8x8xbf16>
    %231 = vector.shape_cast %230 : vector<1x8x8xbf16> to vector<8x8xbf16>
    %232 = arith.truncf %229 : vector<8x256xf32> to vector<8x256xbf16>
    %cst_61 = arith.constant dense<0.000000e+00> : vector<8x256xf32>
    %233 = tpu.matmul %231, %232, %cst_61 {dimension_numbers = #tpu.dot_dimension_numbers<[1], [0], [0], [1], [0, 0, 1, 1], [], []>} : vector<8x8xbf16>, vector<8x256xbf16>, vector<8x256xf32> -> vector<8x256xf32>
    %234 = arith.addf %224, %233 : vector<8x256xf32>
    %c0_62 = arith.constant 0 : index
    %c0_63 = arith.constant 0 : index
    %c0_64 = arith.constant 0 : index
    %235 = vector.load %arg6[%c0_62, %c0_63, %c0_64] : memref<4x8x1xf32, #tpu.memory_space<vmem>>, vector<4x8x1xf32>
    %236 = vector.extract_strided_slice %235 {offsets = [0, 0, 0], sizes = [1, 8, 1], strides = [1, 1, 1]} : vector<4x8x1xf32> to vector<1x8x1xf32>
    %237 = vector.shape_cast %236 : vector<1x8x1xf32> to vector<8x1xf32>
    %238 = vector.extract_strided_slice %235 {offsets = [1, 0, 0], sizes = [1, 8, 1], strides = [1, 1, 1]} : vector<4x8x1xf32> to vector<1x8x1xf32>
    %239 = vector.shape_cast %238 : vector<1x8x1xf32> to vector<8x1xf32>
    %240 = vector.extract_strided_slice %235 {offsets = [2, 0, 0], sizes = [1, 8, 1], strides = [1, 1, 1]} : vector<4x8x1xf32> to vector<1x8x1xf32>
    %241 = vector.shape_cast %240 : vector<1x8x1xf32> to vector<8x1xf32>
    %242 = vector.extract_strided_slice %235 {offsets = [3, 0, 0], sizes = [1, 8, 1], strides = [1, 1, 1]} : vector<4x8x1xf32> to vector<1x8x1xf32>
    %243 = vector.shape_cast %242 : vector<1x8x1xf32> to vector<8x1xf32>
    %244 = vector.broadcast %241 : vector<8x1xf32> to vector<8x256xf32>
    %245 = arith.subf %234, %244 : vector<8x256xf32>
    %cst_65 = arith.constant 9.99999974E-6 : f32
    %246 = vector.broadcast %cst_65 : f32 to vector<8x1xf32>
    %247 = arith.addf %243, %246 : vector<8x1xf32>
    %248 = math.rsqrt %247 : vector<8x1xf32>
    %249 = vector.broadcast %248 : vector<8x1xf32> to vector<8x256xf32>
    %250 = arith.mulf %245, %249 : vector<8x256xf32>
    %251 = vector.broadcast %237 : vector<8x1xf32> to vector<8x256xf32>
    %252 = arith.mulf %250, %251 : vector<8x256xf32>
    %253 = vector.broadcast %239 : vector<8x1xf32> to vector<8x256xf32>
    %254 = arith.addf %252, %253 : vector<8x256xf32>
    %c0_66 = arith.constant 0 : index
    %c0_67 = arith.constant 0 : index
    %c0_68 = arith.constant 0 : index
    %255 = vector.load %arg2[%c0_66, %c0_67, %c0_68] : memref<1x8x256xf32, #tpu.memory_space<vmem>>, vector<1x8x256xf32>
    %256 = vector.shape_cast %255 : vector<1x8x256xf32> to vector<8x256xf32>
    %257 = arith.addf %254, %256 : vector<8x256xf32>
    %c0_69 = arith.constant 0 : index
    %c0_70 = arith.constant 0 : index
    %c0_71 = arith.constant 0 : index
    %258 = vector.load %arg7[%c0_69, %c0_70, %c0_71] : memref<1x8x256xf32, #tpu.memory_space<vmem>>, vector<1x8x256xf32>
    %259 = vector.shape_cast %258 : vector<1x8x256xf32> to vector<8x256xf32>
    %260 = vector.shape_cast %257 : vector<8x256xf32> to vector<1x8x256xf32>
    tpu.vector_store %arg7[%c0_69, %c0_70, %c0_71], %260 {strides = array<i32>} : memref<1x8x256xf32, #tpu.memory_space<vmem>>, vector<1x8x256xf32>,
    return
  }
  func.func @transform_0(%arg0: i32) -> (i32, i32, i32) {
    %c0_i32 = arith.constant 0 : i32
    %c0_i32_0 = arith.constant 0 : i32
    %c0_i32_1 = arith.constant 0 : i32
    %c0_i32_2 = arith.constant 0 : i32
    return %c0_i32, %c0_i32_0, %c0_i32_1 : i32, i32, i32
  }
  func.func @transform_1(%arg0: i32) -> (i32, i32, i32) {
    %c0_i32 = arith.constant 0 : i32
    %c0_i32_0 = arith.constant 0 : i32
    %c0_i32_1 = arith.constant 0 : i32
    return %arg0, %c0_i32, %c0_i32_0 : i32, i32, i32
  }
  func.func @transform_2(%arg0: i32) -> (i32, i32, i32) {
    %c0_i32 = arith.constant 0 : i32
    %c0_i32_0 = arith.constant 0 : i32
    %c0_i32_1 = arith.constant 0 : i32
    %c0_i32_2 = arith.constant 0 : i32
    return %c0_i32, %c0_i32_0, %c0_i32_1 : i32, i32, i32
  }
  func.func @transform_3(%arg0: i32) -> (i32, i32, i32) {
    %c0_i32 = arith.constant 0 : i32
    %c0_i32_0 = arith.constant 0 : i32
    %c0_i32_1 = arith.constant 0 : i32
    %c0_i32_2 = arith.constant 0 : i32
    return %c0_i32, %c0_i32_0, %c0_i32_1 : i32, i32, i32
  }
  func.func @transform_4(%arg0: i32) -> (i32, i32, i32) {
    %c0_i32 = arith.constant 0 : i32
    %c0_i32_0 = arith.constant 0 : i32
    %c0_i32_1 = arith.constant 0 : i32
    %c0_i32_2 = arith.constant 0 : i32
    return %c0_i32, %c0_i32_0, %c0_i32_1 : i32, i32, i32
  }
  func.func @transform_5(%arg0: i32) -> (i32, i32, i32) {
    %c0_i32 = arith.constant 0 : i32
    %c0_i32_0 = arith.constant 0 : i32
    %c0_i32_1 = arith.constant 0 : i32
    %c0_i32_2 = arith.constant 0 : i32
    return %c0_i32, %c0_i32_0, %c0_i32_1 : i32, i32, i32
  }
  func.func @transform_6(%arg0: i32) -> (i32, i32, i32) {
    %c0_i32 = arith.constant 0 : i32
    %c0_i32_0 = arith.constant 0 : i32
    %c0_i32_1 = arith.constant 0 : i32
    return %arg0, %c0_i32, %c0_i32_0 : i32, i32, i32
  }
}

</mosaic_0001>

<bundles_post_ra>
// kernel: basic_block_forward.1
= control target key start
LH: loop header
LB: loop body
LE: loop exit
PB: predicated region body
PF: predicated region fallthrough
CT: control target
= control target key end

     0   :  { %s1976_s21 = smov 0   ;;  %s2402_s0 = inlined_call_operand.vmem [shape: f32[9,1,256], index: 0, kind: input, shape index: {}]   ;;  %s2403_s1 = inlined_call_operand.vmem [shape: f32[2,8,256], index: 1, kind: input, shape index: {}]   ;;  %s2404_s2 = inlined_call_operand.vmem [shape: f32[9,8,8], index: 2, kind: input, shape index: {}]   ;;  %s2405_s3 = inlined_call_operand.vmem [shape: f32[9,8,8], index: 3, kind: input, shape index: {}]   ;;  %s2406_s4 = inlined_call_operand.vmem [shape: f32[4,8,1], index: 4, kind: input, shape index: {}]   ;;  %s2407_s5 = inlined_call_operand.vmem [shape: f32[4,8,1], index: 5, kind: input, shape index: {}]   ;;  %s2408_s6 = inlined_call_operand.vmem [shape: f32[2,8,256], index: 6, kind: output, shape index: {}]  }
   0x1 LB: > { %s1706_s22 = sadd.s32 4294967295, %s1929_s21   ;;  %p1710_p0 = scmp.ge.s32.totalorder %s1929_s21, 1  ;;  %s1929_s21 = sphi %s1976_s21, %s16_s21  }
   0x2   : > { %p212_p1 = scmp.lt.s32.totalorder %s1929_s21, 3 }
   0x4   : > { %p213_p2 = pnand %p1710_p0, %p212_p1 }
   0x5   : > { %p242_p3 = scmp.lt.s32.totalorder (!%p213_p2), %s1706_s22, 1  ;;  %v1931_v2 = vmov (!%p213_p2), 0.0   ;;  %v1932_v7 = vmov (!%p213_p2), 0   ;;  %s1933_s27 = smov (!%p213_p2), 16   ;;  %v974_v9 = vld [vmem:[%s2406_s4 + $0x18] sm:$0xff] (!%p213_p2)  ;;  %v973_v10 = vld [vmem:[%s2406_s4 + $0x10] sm:$0xff] (!%p213_p2)  ;;  %v329_v13 = vlaneseq (!%p213_p2) }
   0x6   : > { %216 = sbr.rel (%p213_p2) target bundleno = 916 (0x394), region = 44  ;;  %414 = vmatprep.mubr.bf16.mxu0 (!%p213_p2), %v1932_v7  ;;  %1878 = vset.pattern.permute.xlu1 (!%p213_p2), %v1932_v7  ;;  %s1934_s28 = smov (!%p213_p2), 15   ;;  %v982_v11 = vadd.f32 (!%p213_p2), 1e-05, %v974_v9  ;;  %v972_v12 = vld [vmem:[%s2406_s4 + $0x8] sm:$0xff] (!%p213_p2)  ;;  %v971_v16 = vld [vmem:[%s2406_s4] sm:$0xff] (!%p213_p2) }
   0x7   : > { %1877 = vset.pattern.permute.xlu0 (!%p213_p2), %v1932_v7  ;;  %1128 = vmatprep.mubr.bf16.mxu1 (!%p213_p2), %v1932_v7  ;;  %s1935_s29 = smov (!%p213_p2), 17   ;;  %s1936_s30 = smov (!%p213_p2), 1   ;;  %v336_v14 = vshrl.u32 (!%p213_p2), %v329_v13, 7  ;;  %v2032_v17 = vand.u32 (!%p213_p2), 127, %v329_v13  ;;  %v272_v20 = vld [vmem:[%s2404_s2 + $0x8] sm:$0xff] (!%p213_p2)  ;;  %vm375_vm9 = vcmask (!%p213_p2), 1043456  }
   0x8   : > { %s1937_s7 = smov (!%p213_p2), 127   ;;  %s1938_s8 = smov (!%p213_p2), 113   ;;  %1919 = vrsqrt.f32 (!%p213_p2), %v982_v11  ;;  %v254_v21 = vld [vmem:[%s2402_s0 + $0x2] sm:$0x3] (!%p213_p2)  ;;  %vm290_vm4 = vcmp.lt.f32.partialorder (!%p213_p2), %v272_v20, 0.0  ;;  %vm281_vm7 = vcmp.gt.f32.partialorder (!%p213_p2), %v272_v20, 0.0 }
   0x9   : > { %s1939_s9 = smov (!%p213_p2), 112   ;;  %s1940_s10 = smov (!%p213_p2), 111   ;;  %v2034_v18 = vsub.s32 (!%p213_p2), 1, %v336_v14  ;;  %v2036_v19 = vsub.s32 (!%p213_p2), 0, %v336_v14  ;;  %v255_v22 = vld [vmem:[%s2402_s0 + $0x4] sm:$0x3] (!%p213_p2) }
   0xa   : > { %vm353_vm5 = vcmp.lt.s32.totalorder (!%p213_p2), %v2032_v17, 16  ;;  %vm477_vm6 = vcmp.lt.s32.totalorder (!%p213_p2), %v2032_v17, 15  ;;  %v253_v29 = vld [vmem:[%s2402_s0] sm:$0x3] (!%p213_p2)  ;;  %v299_v32 = vsel (!%p213_p2), %vm290_vm4, -1.0, %v1931_v2  ;;  %vm331_vm8 = vcmp.lt.s32.totalorder (!%p213_p2), %v2032_v17, 17 }
   0xb   : > { %v2049_v24 = vrot.slane (!%p213_p2), %v254_v21, %v2034_v18  ;;  %v2052_v25 = vrot.slane (!%p213_p2), %v254_v21, %v2036_v19  ;;  %v2060_v33 = vrot.slane (!%p213_p2), %v255_v22, %v2034_v18  ;;  %v2070_v37 = vrot.slane (!%p213_p2), %v253_v29, %v2034_v18  ;;  %v271_v54 = vld [vmem:[%s2404_s2] sm:$0xff] (!%p213_p2) }
   0xc   : > { %v2075_v41 = vrot.slane (!%p213_p2), %v253_v29, %v2036_v19  ;;  %v308_v44 = vsel (!%p213_p2), %vm281_vm7, 1.0, %v299_v32  ;;  %vm371_vm10 = vcmask (!%p213_p2), 64512   ;;  %v2090_v59 = vrot.slane (!%p213_p2), %v255_v22, %v2036_v19  ;;  %v256_v61 = vld [vmem:[%s2402_s0 + $0x6] sm:$0x3] (!%p213_p2) }
   0xd   : > { %s2410_s22 = smov (!%p242_p3, %s1706_s22), 1  ;;  %v317_v52 = vpack.c.bf16 %v308_v44, %v308_v44  ;;  %vm289_vm11 = vcmp.lt.f32.partialorder %v271_v54, 0.0  ;;  %vm551_vm12 = vcmp.lt.s32.totalorder %v2032_v17, 1  ;;  %vm280_vm13 = vcmp.gt.f32.partialorder %v271_v54, 0.0 }
   0xe   : > { %s1753_s23 = sshll.u32 %s2410_s22, 4  ;;  %v2106_v9 = vrot.slane %v256_v61, %v2034_v18  ;;  %v2116_v21 = vrot.slane %v256_v61, %v2036_v19  ;;  %vm753_vm4 = vcmp.lt.s32.totalorder %v2032_v17, 113 }
   0xf   : > { %s246_s26 = scalar_lea.vmem %s2403_s1, %s1753_s23 }
  0x10   : > { %v1992_v0 = vld [vmem:[%s246_s26] sm:$0xff]  ;;  %v1994_v1 = vld [vmem:[%s246_s26 + $0x8] sm:$0xff] }
  0x11   : > { %vm263_vm0 = vcmp.gt.f32.partialorder %v1992_v0, 0.0  ;;  %vm264_vm1 = vcmp.gt.f32.partialorder %v1994_v1, 0.0  ;;  %vm265_vm2 = vcmp.lt.f32.partialorder %v1992_v0, 0.0  ;;  %vm266_vm3 = vcmp.lt.f32.partialorder %v1994_v1, 0.0 }
  0x12   : > { %v267_v3 = vsel %vm265_vm2, -1.0, %v1931_v2  ;;  %v268_v4 = vsel %vm266_vm3, -1.0, %v1931_v2  ;;  %v1920_v15 = vpop.eup %1919 }
  0x13   : > { %v2002_v5 = vsel %vm263_vm0, 1.0, %v267_v3  ;;  %v2004_v6 = vsel %vm264_vm1, 1.0, %v268_v4  ;;  %v298_v4 = vsel %vm289_vm11, -1.0, %v1931_v2  ;;  %vm679_vm1 = vcmp.lt.s32.totalorder %v2032_v17, 127 }
  0x14   : > { %v1837_v8 = vpack.i.bf16 %v2004_v6, %v2002_v5  ;;  %v307_v11 = vsel %vm280_vm13, 1.0, %v298_v4  ;;  %vm827_vm13 = vcmp.lt.s32.totalorder %v2032_v17, 112 }
  0x15   : > { %v316_v14 = vpack.c.bf16 %v307_v11, %v307_v11 }
  0x16   : > { %1838 = vrot.lane.b32.xlu0 %v1837_v8, %s1933_s27  ;;  %1848 = vrot.lane.b32.xlu1 %v1837_v8, %s1934_s28 }
  0x1a   : > { %1843 = vrot.lane.b32.xlu0 %v1837_v8, %s1935_s29  ;;  %1853 = vrot.lane.b32.xlu1 %v1837_v8, %s1936_s30 }
  0x1e   : > { %1858 = vrot.lane.b32.xlu0 %v1837_v8, %s1937_s7  ;;  %1863 = vrot.lane.b32.xlu1 %v1837_v8, %s1938_s8 }
  0x22   : > { %1868 = vrot.lane.b32.xlu0 %v1837_v8, %s1939_s9  ;;  %1873 = vrot.lane.b32.xlu1 %v1837_v8, %s1940_s10 }
  0x26   : > { %977 = vperm.xlu0 %1877, %v973_v10   ;;  %986 = vperm.xlu1 %1878, %v1920_v15   ;;  %v273_v15 = vld [vmem:[%s2404_s2 + $0x10] sm:$0xff] }
  0x27   : > { %vm291_vm14 = vcmp.lt.f32.partialorder %v273_v15, 0.0  ;;  %vm282_vm15 = vcmp.gt.f32.partialorder %v273_v15, 0.0 }
  0x2a   : > { %1000 = vperm.xlu0 %1877, %v972_v12   ;;  %993 = vperm.xlu1 %1878, %v971_v16  }
  0x88   : > { %v1839_v23 = vpop.permute.xlu0 %1838  ;;  %v1849_v26 = vpop.permute.xlu1 %1848 }
  0x89   : > { %v1841_v27 = vunpack.i.h.bf16 %v1839_v23  ;;  %v1840_v28 = vunpack.i.l.bf16 %v1839_v23  ;;  %v1851_v30 = vunpack.i.h.bf16 %v1849_v26  ;;  %v1850_v31 = vunpack.i.l.bf16 %v1849_v26 }
  0x8a   : > { %v300_v23 = vsel %vm291_vm14, -1.0, %v1931_v2 }
  0x8b   : > { %v354_v34 = vsel %vm353_vm5, %v1840_v28, %v1841_v27  ;;  %v355_v35 = vsel %vm353_vm5, %v1841_v27, %v1840_v28  ;;  %v478_v36 = vsel %vm477_vm6, %v1850_v31, %v1851_v30  ;;  %v479_v60 = vsel %vm477_vm6, %v1851_v30, %v1850_v31  ;;  %v274_v30 = vld [vmem:[%s2404_s2 + $0x18] sm:$0xff] }
  0x8c   : > { %v1844_v38 = vpop.permute.xlu0 %1843  ;;  %v368_v39 = vmul.f32 %v2049_v24, %v354_v34  ;;  %v367_v40 = vmul.f32 %v2052_v25, %v355_v35  ;;  %v492_v47 = vmul.f32 %v2060_v33, %v478_v36  ;;  %v1854_v55 = vpop.permute.xlu1 %1853  ;;  %v491_v8 = vmul.f32 %v2090_v59, %v479_v60  ;;  %v257_v35 = vld [vmem:[%s2402_s0 + $0xa] sm:$0x3] }
  0x8d   : > { %v1846_v42 = vunpack.i.h.bf16 %v1844_v38  ;;  %v1845_v43 = vunpack.i.l.bf16 %v1844_v38  ;;  %v1856_v62 = vunpack.i.h.bf16 %v1854_v55  ;;  %v1855_v63 = vunpack.i.l.bf16 %v1854_v55 }
  0x8e   : > { %v370_v45 = vpack.c.bf16 %v368_v39, %v368_v39  ;;  %v369_v46 = vpack.c.bf16 %v367_v40, %v367_v40  ;;  %v494_v58 = vpack.c.bf16 %v492_v47, %v492_v47  ;;  %v493_v12 = vpack.c.bf16 %v491_v8, %v491_v8 }
  0x8f   : > { %v332_v48 = vsel %vm331_vm8, %v1845_v43, %v1846_v42  ;;  %v333_v49 = vsel %vm331_vm8, %v1846_v42, %v1845_v43  ;;  %v552_v10 = vsel %vm551_vm12, %v1855_v63, %v1856_v62  ;;  %v553_v22 = vsel %vm551_vm12, %v1856_v62, %v1855_v63  ;;  %v276_v63 = vld [vmem:[%s2404_s2 + $0x28] sm:$0xff] }
  0x90   : > { %v346_v50 = vmul.f32 %v2070_v37, %v332_v48  ;;  %1715 = vmatprep.subr.msk.bf16.mxu0 %vm375_vm9, %v370_v45  ;;  %v377_v51 = vsel %vm375_vm9, %v369_v46, 0  ;;  %v345_v53 = vmul.f32 %v2075_v41, %v333_v49  ;;  %v566_v13 = vmul.f32 %v2106_v9, %v552_v10  ;;  %v1859_v31 = vpop.permute.xlu0 %1858  ;;  %v275_v46 = vld [vmem:[%s2404_s2 + $0x20] sm:$0xff]  ;;  %v1864_v47 = vpop.permute.xlu1 %1863 }
  0x91   : > { %383 = vmatpush1.bf16.msra.mxu0 %v377_v51  ;;  %v499_v16 = vsel %vm375_vm9, %v493_v12, 0  ;;  %v565_v26 = vmul.f32 %v2116_v21, %v553_v22  ;;  %v309_v27 = vsel %vm282_vm15, 1.0, %v300_v23  ;;  %v622_v34 = vpack.c.bf16 %v2004_v6, %v2004_v6  ;;  %v259_v12 = vld [vmem:[%s2402_s0 + $0xe] sm:$0x3] }
  0x92   : > { %v348_v56 = vpack.c.bf16 %v346_v50, %v346_v50  ;;  %v347_v57 = vpack.c.bf16 %v345_v53, %v345_v53  ;;  %v568_v20 = vpack.c.bf16 %v566_v13, %v566_v13  ;;  %v318_v29 = vpack.c.bf16 %v309_v27, %v309_v27 }
  0x93   : > { %v567_v28 = vpack.c.bf16 %v565_v26, %v565_v26  ;;  %vm292_vm0 = vcmp.lt.f32.partialorder %v274_v30, 0.0  ;;  %v1861_v36 = vunpack.i.h.bf16 %v1859_v31  ;;  %v1860_v38 = vunpack.i.l.bf16 %v1859_v31 }
  0x94   : > { %1716 = vmatmul.mubr.msk.bf16.vlgmr.msra.gmra.mrb[0].mxu0 %vm371_vm10, %v317_v52  ;;  %1717 = vmatprep.subr.msk.bf16.mxu0 %vm375_vm9, %v348_v56  ;;  %v427_v3 = vsel %vm375_vm9, %v347_v57, 0  ;;  %vm283_vm2 = vcmp.gt.f32.partialorder %v274_v30, 0.0  ;;  %v301_v39 = vsel %vm292_vm0, -1.0, %v1931_v2  ;;  %v2140_v6 = vrot.slane %v257_v35, %v2034_v18  ;;  %v1874_v30 = vpop.permute.xlu1 %1873 }
  0x95   : > { %433 = vmatpush1.bf16.msra.mxu0 %v427_v3  ;;  %464 = vmatprep.mubr.bf16.mxu0 %v1932_v7  ;;  %v573_v32 = vsel %vm375_vm9, %v567_v28, 0  ;;  %v681_v40 = vsel %vm679_vm1, %v1861_v36, %v1860_v38  ;;  %v310_v42 = vsel %vm283_vm2, 1.0, %v301_v39  ;;  %v621_v43 = vpack.c.bf16 %v2002_v5, %v2002_v5  ;;  %v258_v5 = vld [vmem:[%s2402_s0 + $0xc] sm:$0x3]  ;;  %v1869_v3 = vpop.permute.xlu0 %1868 }
  0x96   : > { %1719 = vmatprep.subr.msk.bf16.mxu0 %vm375_vm9, %v494_v58  ;;  %v694_v44 = vmul.f32 %v2140_v6, %v681_v40  ;;  %v319_v45 = vpack.c.bf16 %v310_v42, %v310_v42  ;;  %v2152_v50 = vrot.slane %v257_v35, %v2036_v19  ;;  %v680_v51 = vsel %vm679_vm1, %v1860_v38, %v1861_v36  ;;  %v260_v36 = vld [vmem:[%s2402_s0 + $0x10] sm:$0x3] }
  0x97   : > { %v627_v48 = vsel %vm375_vm9, %v621_v43, 0  ;;  %vm293_vm3 = vcmp.lt.f32.partialorder %v275_v46, 0.0  ;;  %v1866_v52 = vunpack.i.h.bf16 %v1864_v47  ;;  %v1865_v53 = vunpack.i.l.bf16 %v1864_v47 }
  0x98   : > { %v696_v49 = vpack.c.bf16 %v694_v44, %v694_v44  ;;  %vm284_vm7 = vcmp.gt.f32.partialorder %v275_v46, 0.0  ;;  %v302_v54 = vsel %vm293_vm3, -1.0, %v1931_v2  ;;  %v693_v55 = vmul.f32 %v2152_v50, %v680_v51 }
  0x99   : > { %v2166_v56 = vrot.slane %v258_v5, %v2034_v18  ;;  %v755_v57 = vsel %vm753_vm4, %v1866_v52, %v1865_v53  ;;  %v311_v58 = vsel %vm284_vm7, 1.0, %v302_v54  ;;  %v2176_v10 = vrot.slane %v258_v5, %v2036_v19 }
  0x9a   : > { %v695_v60 = vpack.c.bf16 %v693_v55, %v693_v55  ;;  %v320_v62 = vpack.c.bf16 %v311_v58, %v311_v58  ;;  %v754_v11 = vsel %vm753_vm4, %v1865_v53, %v1866_v52  ;;  %vm294_vm11 = vcmp.lt.f32.partialorder %v276_v63, 0.0  ;;  %v279_v58 = vld [vmem:[%s2404_s2 + $0x40] sm:$0xff] }
  0x9b   : > { %v768_v61 = vmul.f32 %v2166_v56, %v755_v57  ;;  %v1871_v13 = vunpack.i.h.bf16 %v1869_v3  ;;  %vm285_vm14 = vcmp.gt.f32.partialorder %v276_v63, 0.0  ;;  %v303_v15 = vsel %vm294_vm11, -1.0, %v1931_v2 }
  0x9c   : > { %v701_v4 = vsel %vm375_vm9, %v695_v60, 0  ;;  %v312_v23 = vsel %vm285_vm14, 1.0, %v303_v15  ;;  %v1876_v38 = vunpack.i.h.bf16 %v1874_v30  ;;  %v1875_v39 = vunpack.i.l.bf16 %v1874_v30 }
  0x9d   : > { %v770_v8 = vpack.c.bf16 %v768_v61, %v768_v61  ;;  %v321_v28 = vpack.c.bf16 %v312_v23, %v312_v23  ;;  %vm901_vm0 = vcmp.lt.s32.totalorder %v2032_v17, 111  ;;  %v2214_v43 = vrot.slane %v260_v36, %v2034_v18 }
  0x9e   : > { %v903_v44 = vsel %vm901_vm0, %v1876_v38, %v1875_v39  ;;  %v2224_v52 = vrot.slane %v260_v36, %v2036_v19  ;;  %vm297_vm11 = vcmp.lt.f32.partialorder %v279_v58, 0.0  ;;  %vm288_vm14 = vcmp.gt.f32.partialorder %v279_v58, 0.0 }
  0x9f   : > { %v916_v47 = vmul.f32 %v2214_v43, %v903_v44  ;;  %v306_v61 = vsel %vm297_vm11, -1.0, %v1931_v2  ;;  %v1615_v44 = vld [vmem:[%s2407_s5 + $0x10] sm:$0xff] }
  0xa0   : > { %1718 = vmatmul.mubr.msk.bf16.vlgmr.msra.gmra.mrb[0].mxu0 %vm371_vm10, %v316_v14  ;;  %v1870_v14 = vunpack.i.l.bf16 %v1869_v3 }
  0xa1   : > { %505 = vmatpush1.bf16.msra.mxu0 %v499_v16  ;;  %536 = vmatprep.mubr.bf16.mxu0 %v1932_v7  ;;  %v767_v16 = vmul.f32 %v2176_v10, %v754_v11  ;;  %v918_v5 = vpack.c.bf16 %v916_v47, %v916_v47  ;;  %v1014_v47 = vld [vmem:[%s2405_s3 + $0x8] sm:$0xff] }
  0xa2   : > { %1721 = vmatprep.subr.msk.bf16.mxu0 %vm375_vm9, %v568_v20  ;;  %v2190_v20 = vrot.slane %v259_v12, %v2034_v18  ;;  %v829_v22 = vsel %vm827_vm13, %v1871_v13, %v1870_v14  ;;  %v828_v35 = vsel %vm827_vm13, %v1870_v14, %v1871_v13  ;;  %v902_v18 = vsel %vm901_vm0, %v1875_v39, %v1876_v38 }
  0xa3   : > { %v769_v26 = vpack.c.bf16 %v767_v16, %v767_v16  ;;  %v915_v54 = vmul.f32 %v2224_v52, %v902_v18  ;;  %vm1032_vm11 = vcmp.lt.f32.partialorder %v1014_v47, 0.0 }
  0xa4   : > { %v842_v27 = vmul.f32 %v2190_v20, %v829_v22 }
  0xa5   : > { %v775_v31 = vsel %vm375_vm9, %v769_v26, 0  ;;  %v917_v57 = vpack.c.bf16 %v915_v54, %v915_v54  ;;  %v987_v3 = vpop.permute.xlu1 %986 }
  0xa7   : > { %v923_v60 = vsel %vm375_vm9, %v917_v57, 0 }
  0xa9   : > { %v994_v22 = vpop.permute.xlu1 %993 }
  0xac   : > { %1720 = vmatmul.mubr.msk.bf16.vlgmr.msra.gmra.mrb[0].mxu0 %vm371_vm10, %v318_v29  ;;  %v277_v29 = vld [vmem:[%s2404_s2 + $0x30] sm:$0xff] }
  0xad   : > { %579 = vmatpush1.bf16.msra.mxu0 %v573_v32  ;;  %610 = vmatprep.mubr.bf16.mxu0 %v1932_v7  ;;  %v844_v32 = vpack.c.bf16 %v842_v27, %v842_v27  ;;  %vm295_vm15 = vcmp.lt.f32.partialorder %v277_v29, 0.0  ;;  %vm286_vm2 = vcmp.gt.f32.partialorder %v277_v29, 0.0 }
  0xae   : > { %1723 = vmatprep.subr.msk.bf16.mxu0 %vm375_vm9, %v622_v34  ;;  %v2200_v34 = vrot.slane %v259_v12, %v2036_v19  ;;  %v304_v40 = vsel %vm295_vm15, -1.0, %v1931_v2 }
  0xb0   : > { %v841_v42 = vmul.f32 %v2200_v34, %v828_v35 }
  0xb2   : > { %v843_v46 = vpack.c.bf16 %v841_v42, %v841_v42 }
  0xb4   : > { %v849_v51 = vsel %vm375_vm9, %v843_v46, 0  ;;  %v1613_v46 = vld [vmem:[%s2407_s5] sm:$0xff] }
  0xb8   : > { %1722 = vmatmul.mubr.msk.bf16.vlgmr.msra.gmra.mrb[0].mxu0 %vm371_vm10, %v319_v45  ;;  %v313_v45 = vsel %vm286_vm2, 1.0, %v304_v40 }
  0xb9   : > { %633 = vmatpush1.bf16.msra.mxu0 %v627_v48  ;;  %664 = vmatprep.mubr.bf16.mxu0 %v1932_v7  ;;  %v322_v48 = vpack.c.bf16 %v313_v45, %v313_v45  ;;  %v1614_v45 = vld [vmem:[%s2407_s5 + $0x8] sm:$0xff] }
  0xba   : > { %1725 = vmatprep.subr.msk.bf16.mxu0 %vm375_vm9, %v696_v49  ;;  %v278_v49 = vld [vmem:[%s2404_s2 + $0x38] sm:$0xff] }
  0xbb   : > { %vm296_vm3 = vcmp.lt.f32.partialorder %v278_v49, 0.0  ;;  %vm287_vm7 = vcmp.gt.f32.partialorder %v278_v49, 0.0 }
  0xbc   : > { %v305_v53 = vsel %vm296_vm3, -1.0, %v1931_v2 }
  0xbd   : > { %v314_v55 = vsel %vm287_vm7, 1.0, %v305_v53 }
  0xbe   : > { %v323_v19 = vpack.c.bf16 %v314_v55, %v314_v55 }
  0xc4   : > { %1724 = vmatmul.mubr.msk.bf16.vlgmr.msra.gmra.mrb[0].mxu0 %vm371_vm10, %v320_v62  ;;  %v315_v62 = vsel %vm288_vm14, 1.0, %v306_v61  ;;  %vm1023_vm14 = vcmp.gt.f32.partialorder %v1014_v47, 0.0 }
  0xc5   : > { %707 = vmatpush1.bf16.msra.mxu0 %v701_v4  ;;  %738 = vmatprep.mubr.bf16.mxu0 %v1932_v7  ;;  %v324_v63 = vpack.c.bf16 %v315_v62, %v315_v62  ;;  %v978_v4 = vpop.permute.xlu0 %977 }
  0xc6   : > { %1727 = vmatprep.subr.msk.bf16.mxu0 %vm375_vm9, %v770_v8 }
  0xc9   : > { %v1001_v27 = vpop.permute.xlu0 %1000 }
  0xd0   : > { %1726 = vmatmul.mubr.msk.bf16.vlgmr.msra.gmra.mrb[0].mxu0 %vm371_vm10, %v321_v28 }
  0xd1   : > { %781 = vmatpush1.bf16.msra.mxu0 %v775_v31  ;;  %812 = vmatprep.mubr.bf16.mxu0 %v1932_v7  ;;  %v1616_v31 = vld [vmem:[%s2407_s5 + $0x18] sm:$0xff] }
  0xd2   : > { %1729 = vmatprep.subr.msk.bf16.mxu0 %vm375_vm9, %v844_v32  ;;  %v1624_v39 = vadd.f32 1e-05, %v1616_v31 }
  0xd4   : > { %1921 = vrsqrt.f32 %v1624_v39 }
  0xdc   : > { %1728 = vmatmul.mubr.msk.bf16.vlgmr.msra.gmra.mrb[0].mxu0 %vm371_vm10, %v322_v48  ;;  %v1041_v48 = vsel %vm1032_vm11, -1.0, %v1931_v2 }
  0xdd   : > { %855 = vmatpush1.bf16.msra.mxu0 %v849_v51  ;;  %886 = vmatprep.mubr.bf16.mxu0 %v1932_v7  ;;  %v1050_v55 = vsel %vm1023_vm14, 1.0, %v1041_v48 }
  0xde   : > { %1731 = vmatprep.subr.msk.bf16.mxu0 %vm375_vm9, %v918_v5  ;;  %v1922_v42 = vpop.eup %1921 }
  0xe8   : > { %1730 = vmatmul.mubr.msk.bf16.vlgmr.msra.gmra.mrb[0].mxu0 %vm371_vm10, %v323_v19 }
  0xe9   : > { %929 = vmatpush1.bf16.msra.mxu0 %v923_v60  ;;  %960 = vmatprep.mubr.bf16.mxu0 %v1932_v7 }
  0xf4   : > { %1732 = vmatmul.mubr.msk.bf16.vlgmr.msra.gmra.mrb[0].mxu0 %vm371_vm10, %v324_v63 }
 0x1c7   : > { %v962_v8 = vpop.f32.mrb[0].mxu0 }
 0x1c8   : > { %v980_v11 = vsub.f32 %v962_v8, %v978_v4  ;;  %v964_v12 = vpop.f32.mrb[1].mxu0 }
 0x1c9   : > { %v981_v13 = vsub.f32 %v964_v12, %v978_v4  ;;  %v966_v14 = vpop.f32.mrb[2].mxu0 }
 0x1ca   : > { %v989_v15 = vmul.f32 %v987_v3, %v980_v11  ;;  %v967_v16 = vpop.f32.mrb[3].mxu0 }
 0x1cb   : > { %v990_v23 = vmul.f32 %v987_v3, %v981_v13 }
 0x1cc   : > { %v996_v26 = vmul.f32 %v994_v22, %v989_v15  ;;  %v1059_v15 = vpack.c.bf16 %v1050_v55, %v1050_v55 }
 0x1cd   : > { %v997_v28 = vmul.f32 %v994_v22, %v990_v23 }
 0x1ce   : > { %v1003_v29 = vadd.f32 %v1001_v27, %v996_v26 }
 0x1cf   : > { %v1004_v30 = vadd.f32 %v1001_v27, %v997_v28 }
 0x1d0   : > { %vm1005_vm15 = vcmp.gt.f32.partialorder %v1003_v29, 0.0  ;;  %vm1007_vm2 = vcmp.lt.f32.partialorder %v1003_v29, 0.0 }
 0x1d1   : > { %v1009_v32 = vsel %vm1007_vm2, -1.0, %v1931_v2  ;;  %vm1006_vm3 = vcmp.gt.f32.partialorder %v1004_v30, 0.0  ;;  %vm1008_vm7 = vcmp.lt.f32.partialorder %v1004_v30, 0.0 }
 0x1d2   : > { %v2245_v35 = vsel %vm1005_vm15, 1.0, %v1009_v32  ;;  %v1010_v36 = vsel %vm1008_vm7, -1.0, %v1931_v2 }
 0x1d3   : > { %v2248_v38 = vsel %vm1006_vm3, 1.0, %v1010_v36 }
 0x1d4   : > { %v1884_v40 = vpack.i.bf16 %v2248_v38, %v2245_v35 }
 0x1d6   : > { %1885 = vrot.lane.b32.xlu0 %v1884_v40, %s1935_s29  ;;  %1880 = vrot.lane.b32.xlu1 %v1884_v40, %s1933_s27 }
 0x1da   : > { %1895 = vrot.lane.b32.xlu0 %v1884_v40, %s1936_s30  ;;  %1890 = vrot.lane.b32.xlu1 %v1884_v40, %s1934_s28  ;;  %s251_s30 = scalar_lea.vmem %s2408_s6, %s1753_s23 }
 0x1de   : > { %1905 = vrot.lane.b32.xlu0 %v1884_v40, %s1938_s8  ;;  %1900 = vrot.lane.b32.xlu1 %v1884_v40, %s1937_s7 }
 0x1e2   : > { %1915 = vrot.lane.b32.xlu0 %v1884_v40, %s1940_s10  ;;  %1910 = vrot.lane.b32.xlu1 %v1884_v40, %s1939_s9 }
 0x1e6   : > { %1628 = vperm.xlu0 %1877, %v1922_v42   ;;  %1619 = vperm.xlu1 %1878, %v1615_v44   ;;  %v1015_v42 = vld [vmem:[%s2405_s3 + $0x10] sm:$0xff] }
 0x1e7   : > { %vm1024_vm15 = vcmp.gt.f32.partialorder %v1015_v42, 0.0 }
 0x1ea   : > { %1642 = vperm.xlu0 %1877, %v1614_v45   ;;  %1635 = vperm.xlu1 %1878, %v1613_v46  }
 0x248   : > { %v1886_v49 = vpop.permute.xlu0 %1885  ;;  %v1881_v51 = vpop.permute.xlu1 %1880 }
 0x249   : > { %v1888_v5 = vunpack.i.h.bf16 %v1886_v49  ;;  %v1887_v18 = vunpack.i.l.bf16 %v1886_v49  ;;  %v1883_v53 = vunpack.i.h.bf16 %v1881_v51  ;;  %v1882_v54 = vunpack.i.l.bf16 %v1881_v51  ;;  %v1016_v51 = vld [vmem:[%s2405_s3 + $0x18] sm:$0xff] }
 0x24a   : > { %vm1034_vm2 = vcmp.lt.f32.partialorder %v1016_v51, 0.0 }
 0x24b   : > { %v1071_v57 = vsel %vm331_vm8, %v1887_v18, %v1888_v5  ;;  %v1072_v19 = vsel %vm331_vm8, %v1888_v5, %v1887_v18  ;;  %v1081_v58 = vsel %vm353_vm5, %v1882_v54, %v1883_v53  ;;  %v1082_v60 = vsel %vm353_vm5, %v1883_v53, %v1882_v54 }
 0x24c   : > { %v1074_v61 = vmul.f32 %v1071_v57, %v2070_v37  ;;  %v1891_v62 = vpop.permute.xlu1 %1890  ;;  %v1084_v63 = vmul.f32 %v1081_v58, %v2049_v24  ;;  %v1083_v3 = vmul.f32 %v1082_v60, %v2052_v25  ;;  %v1073_v4 = vmul.f32 %v1072_v19, %v2075_v41  ;;  %v1013_v25 = vld [vmem:[%s2405_s3] sm:$0xff]  ;;  %v1896_v41 = vpop.permute.xlu0 %1895 }
 0x24d   : > { %v1893_v8 = vunpack.i.h.bf16 %v1891_v62  ;;  %v1892_v11 = vunpack.i.l.bf16 %v1891_v62  ;;  %vm1031_vm5 = vcmp.lt.f32.partialorder %v1013_v25, 0.0  ;;  %v1898_v26 = vunpack.i.h.bf16 %v1896_v41 }
 0x24e   : > { %v1086_v12 = vpack.c.bf16 %v1084_v63, %v1084_v63  ;;  %v1085_v13 = vpack.c.bf16 %v1083_v3, %v1083_v3  ;;  %v1076_v22 = vpack.c.bf16 %v1074_v61, %v1074_v61  ;;  %v1075_v24 = vpack.c.bf16 %v1073_v4, %v1073_v4  ;;  %v1017_v61 = vld [vmem:[%s2405_s3 + $0x20] sm:$0xff] }
 0x24f   : > { %v1191_v14 = vsel %vm477_vm6, %v1892_v11, %v1893_v8  ;;  %v1897_v27 = vunpack.i.l.bf16 %v1896_v41  ;;  %v1192_v28 = vsel %vm477_vm6, %v1893_v8, %v1892_v11  ;;  %vm1022_vm8 = vcmp.gt.f32.partialorder %v1013_v25, 0.0 }
 0x250   : > { %v1194_v16 = vmul.f32 %v1191_v14, %v2060_v33  ;;  %1733 = vmatprep.subr.msk.bf16.mxu1 %vm375_vm9, %v1086_v12  ;;  %v1091_v37 = vsel %vm375_vm9, %v1085_v13, 0  ;;  %v1141_v23 = vsel %vm375_vm9, %v1075_v24, 0  ;;  %v1040_v29 = vsel %vm1031_vm5, -1.0, %v1931_v2  ;;  %v1901_v5 = vpop.permute.xlu1 %1900  ;;  %v1906_v62 = vpop.permute.xlu0 %1905 }
 0x251   : > { %1097 = vmatpush1.bf16.msra.mxu1 %v1091_v37  ;;  %v1193_v30 = vmul.f32 %v1192_v28, %v2090_v59  ;;  %v1253_v31 = vsel %vm551_vm12, %v1897_v27, %v1898_v26  ;;  %v1049_v32 = vsel %vm1022_vm8, 1.0, %v1040_v29  ;;  %vm1033_vm6 = vcmp.lt.f32.partialorder %v1015_v42, 0.0  ;;  %v1018_v37 = vld [vmem:[%s2405_s3 + $0x28] sm:$0xff] }
 0x252   : > { %1735 = vmatprep.subr.msk.bf16.mxu1 %vm375_vm9, %v1076_v22  ;;  %v1196_v33 = vpack.c.bf16 %v1194_v16, %v1194_v16  ;;  %v1256_v36 = vmul.f32 %v1253_v31, %v2106_v9  ;;  %v1058_v39 = vpack.c.bf16 %v1049_v32, %v1049_v32  ;;  %v1254_v59 = vsel %vm551_vm12, %v1898_v26, %v1897_v27  ;;  %v1019_v31 = vld [vmem:[%s2405_s3 + $0x30] sm:$0xff] }
 0x253   : > { %v1195_v40 = vpack.c.bf16 %v1193_v30, %v1193_v30  ;;  %v1042_v9 = vsel %vm1033_vm6, -1.0, %v1931_v2  ;;  %v1255_v46 = vmul.f32 %v1254_v59, %v2116_v21  ;;  %v1312_v53 = vpack.c.bf16 %v2248_v38, %v2248_v38 }
 0x254   : > { %1734 = vmatmul.mubr.msk.bf16.vlgmr.msra.gmra.mrb[0].mxu1 %vm371_vm10, %v1059_v15  ;;  %v1258_v45 = vpack.c.bf16 %v1256_v36, %v1256_v36  ;;  %v1051_v47 = vsel %vm1024_vm15, 1.0, %v1042_v9  ;;  %v1903_v54 = vunpack.i.h.bf16 %v1901_v5  ;;  %v1902_v55 = vunpack.i.l.bf16 %v1901_v5  ;;  %v1911_v22 = vpop.permute.xlu1 %1910  ;;  %v1916_v32 = vpop.permute.xlu0 %1915 }
 0x255   : > { %1147 = vmatpush1.bf16.msra.mxu1 %v1141_v23  ;;  %1178 = vmatprep.mubr.bf16.mxu1 %v1932_v7  ;;  %v1201_v44 = vsel %vm375_vm9, %v1195_v40, 0  ;;  %v1060_v48 = vpack.c.bf16 %v1051_v47, %v1051_v47  ;;  %v1257_v49 = vpack.c.bf16 %v1255_v46, %v1255_v46  ;;  %vm1025_vm12 = vcmp.gt.f32.partialorder %v1016_v51, 0.0 }
 0x256   : > { %1737 = vmatprep.subr.msk.bf16.mxu1 %vm375_vm9, %v1196_v33  ;;  %v1043_v21 = vsel %vm1034_vm2, -1.0, %v1931_v2  ;;  %v1370_v57 = vsel %vm679_vm1, %v1903_v54, %v1902_v55  ;;  %v1311_v38 = vpack.c.bf16 %v2245_v35, %v2245_v35  ;;  %vm1035_vm3 = vcmp.lt.f32.partialorder %v1017_v61, 0.0 }
 0x257   : > { %v1263_v18 = vsel %vm375_vm9, %v1257_v49, 0  ;;  %v1052_v19 = vsel %vm1025_vm12, 1.0, %v1043_v21  ;;  %v1372_v58 = vmul.f32 %v1370_v57, %v2140_v6  ;;  %v1908_v4 = vunpack.i.h.bf16 %v1906_v62 }
 0x258   : > { %v1061_v60 = vpack.c.bf16 %v1052_v19, %v1052_v19  ;;  %v1317_v63 = vsel %vm375_vm9, %v1311_v38, 0  ;;  %v1907_v8 = vunpack.i.l.bf16 %v1906_v62  ;;  %v1369_v6 = vsel %vm679_vm1, %v1902_v55, %v1903_v54  ;;  %v1021_v55 = vld [vmem:[%s2405_s3 + $0x40] sm:$0xff] }
 0x259   : > { %v1374_v3 = vpack.c.bf16 %v1372_v58, %v1372_v58  ;;  %vm1026_vm7 = vcmp.gt.f32.partialorder %v1017_v61, 0.0  ;;  %v1044_v35 = vsel %vm1035_vm3, -1.0, %v1931_v2  ;;  %v1371_v11 = vmul.f32 %v1369_v6, %v2152_v50 }
 0x25a   : > { %v1432_v12 = vsel %vm753_vm4, %v1908_v4, %v1907_v8  ;;  %v1053_v13 = vsel %vm1026_vm7, 1.0, %v1044_v35  ;;  %vm1036_vm1 = vcmp.lt.f32.partialorder %v1018_v37, 0.0  ;;  %v1431_v50 = vsel %vm753_vm4, %v1907_v8, %v1908_v4 }
 0x25b   : > { %v1434_v14 = vmul.f32 %v1432_v12, %v2166_v56  ;;  %v1062_v15 = vpack.c.bf16 %v1053_v13, %v1053_v13  ;;  %v1373_v16 = vpack.c.bf16 %v1371_v11, %v1371_v11  ;;  %v1913_v41 = vunpack.i.h.bf16 %v1911_v22 }
 0x25c   : > { %v1912_v23 = vunpack.i.l.bf16 %v1911_v22  ;;  %vm1027_vm11 = vcmp.gt.f32.partialorder %v1018_v37, 0.0  ;;  %v1045_v56 = vsel %vm1036_vm1, -1.0, %v1931_v2  ;;  %v1433_v33 = vmul.f32 %v1431_v50, %v2176_v10 }
 0x25d   : > { %v1379_v24 = vsel %vm375_vm9, %v1373_v16, 0  ;;  %v1436_v25 = vpack.c.bf16 %v1434_v14, %v1434_v14  ;;  %v1054_v27 = vsel %vm1027_vm11, 1.0, %v1045_v56  ;;  %vm1037_vm4 = vcmp.lt.f32.partialorder %v1019_v31, 0.0 }
 0x25e   : > { %v1494_v26 = vsel %vm827_vm13, %v1913_v41, %v1912_v23  ;;  %v1063_v29 = vpack.c.bf16 %v1054_v27, %v1054_v27  ;;  %v1435_v30 = vpack.c.bf16 %v1433_v33, %v1433_v33  ;;  %v1918_v10 = vunpack.i.h.bf16 %v1916_v32 }
 0x25f   : > { %v1496_v28 = vmul.f32 %v1494_v26, %v2190_v20  ;;  %v1917_v40 = vunpack.i.l.bf16 %v1916_v32  ;;  %v1493_v42 = vsel %vm827_vm13, %v1912_v23, %v1913_v41  ;;  %vm1028_vm14 = vcmp.gt.f32.partialorder %v1019_v31, 0.0 }
 0x260   : > { %1736 = vmatmul.mubr.msk.bf16.vlgmr.msra.gmra.mrb[0].mxu1 %vm371_vm10, %v1058_v39  ;;  %v1441_v36 = vsel %vm375_vm9, %v1435_v30, 0  ;;  %v1046_v20 = vsel %vm1037_vm4, -1.0, %v1931_v2  ;;  %vm1039_vm8 = vcmp.lt.f32.partialorder %v1021_v55, 0.0 }
 0x261   : > { %1207 = vmatpush1.bf16.msra.mxu1 %v1201_v44  ;;  %1238 = vmatprep.mubr.bf16.mxu1 %v1932_v7  ;;  %v1498_v39 = vpack.c.bf16 %v1496_v28, %v1496_v28  ;;  %v1495_v44 = vmul.f32 %v1493_v42, %v2200_v34  ;;  %v1055_v59 = vsel %vm1028_vm14, 1.0, %v1046_v20  ;;  %v1555_v34 = vsel %vm901_vm0, %v1917_v40, %v1918_v10 }
 0x262   : > { %1739 = vmatprep.subr.msk.bf16.mxu1 %vm375_vm9, %v1258_v45  ;;  %v1556_v45 = vsel %vm901_vm0, %v1918_v10, %v1917_v40  ;;  %v1064_v46 = vpack.c.bf16 %v1055_v59, %v1055_v59  ;;  %v1557_v5 = vmul.f32 %v1555_v34, %v2224_v52  ;;  %vm1030_vm0 = vcmp.gt.f32.partialorder %v1021_v55, 0.0 }
 0x263   : > { %v1558_v9 = vmul.f32 %v1556_v45, %v2214_v43  ;;  %v1497_v47 = vpack.c.bf16 %v1495_v44, %v1495_v44  ;;  %v1048_v21 = vsel %vm1039_vm8, -1.0, %v1931_v2 }
 0x264   : > { %v1559_v54 = vpack.c.bf16 %v1557_v5, %v1557_v5  ;;  %v1057_v57 = vsel %vm1030_vm0, 1.0, %v1048_v21 }
 0x265   : > { %v1503_v49 = vsel %vm375_vm9, %v1497_v47, 0  ;;  %v1560_v51 = vpack.c.bf16 %v1558_v9, %v1558_v9  ;;  %v1066_v52 = vpack.c.bf16 %v1057_v57, %v1057_v57  ;;  %v1620_v19 = vpop.permute.xlu1 %1619  ;;  %v1629_v58 = vpop.permute.xlu0 %1628 }
 0x266   : > { %v1565_v17 = vsel %vm375_vm9, %v1559_v54, 0 }
 0x269   : > { %v1636_v8 = vpop.permute.xlu1 %1635  ;;  %v1643_v35 = vpop.permute.xlu0 %1642 }
 0x26c   : > { %1738 = vmatmul.mubr.msk.bf16.vlgmr.msra.gmra.mrb[0].mxu1 %vm371_vm10, %v1060_v48  ;;  %v1020_v48 = vld [vmem:[%s2405_s3 + $0x38] sm:$0xff] }
 0x26d   : > { %1269 = vmatpush1.bf16.msra.mxu1 %v1263_v18  ;;  %1300 = vmatprep.mubr.bf16.mxu1 %v1932_v7  ;;  %vm1038_vm13 = vcmp.lt.f32.partialorder %v1020_v48, 0.0  ;;  %vm1029_vm5 = vcmp.gt.f32.partialorder %v1020_v48, 0.0 }
 0x26e   : > { %1741 = vmatprep.subr.msk.bf16.mxu1 %vm375_vm9, %v1312_v53  ;;  %v1047_v43 = vsel %vm1038_vm13, -1.0, %v1931_v2 }
 0x26f   : > { %v1056_v18 = vsel %vm1029_vm5, 1.0, %v1047_v43 }
 0x270   : > { %v1065_v53 = vpack.c.bf16 %v1056_v18, %v1056_v18 }
 0x278   : > { %1740 = vmatmul.mubr.msk.bf16.vlgmr.msra.gmra.mrb[0].mxu1 %vm371_vm10, %v1061_v60 }
 0x279   : > { %1323 = vmatpush1.bf16.msra.mxu1 %v1317_v63  ;;  %1354 = vmatprep.mubr.bf16.mxu1 %v1932_v7 }
 0x27a   : > { %1743 = vmatprep.subr.msk.bf16.mxu1 %vm375_vm9, %v1374_v3 }
 0x284   : > { %1742 = vmatmul.mubr.msk.bf16.vlgmr.msra.gmra.mrb[0].mxu1 %vm371_vm10, %v1062_v15 }
 0x285   : > { %1385 = vmatpush1.bf16.msra.mxu1 %v1379_v24  ;;  %1416 = vmatprep.mubr.bf16.mxu1 %v1932_v7 }
 0x286   : > { %1745 = vmatprep.subr.msk.bf16.mxu1 %vm375_vm9, %v1436_v25 }
 0x290   : > { %1744 = vmatmul.mubr.msk.bf16.vlgmr.msra.gmra.mrb[0].mxu1 %vm371_vm10, %v1063_v29 }
 0x291   : > { %1447 = vmatpush1.bf16.msra.mxu1 %v1441_v36  ;;  %1478 = vmatprep.mubr.bf16.mxu1 %v1932_v7 }
 0x292   : > { %1747 = vmatprep.subr.msk.bf16.mxu1 %vm375_vm9, %v1498_v39 }
 0x29c   : > { %1746 = vmatmul.mubr.msk.bf16.vlgmr.msra.gmra.mrb[0].mxu1 %vm371_vm10, %v1064_v46 }
 0x29d   : > { %1509 = vmatpush1.bf16.msra.mxu1 %v1503_v49  ;;  %1540 = vmatprep.mubr.bf16.mxu1 %v1932_v7 }
 0x29e   : > { %1749 = vmatprep.subr.msk.bf16.mxu1 %vm375_vm9, %v1560_v51 }
 0x2a8   : > { %1748 = vmatmul.mubr.msk.bf16.vlgmr.msra.gmra.mrb[0].mxu1 %vm371_vm10, %v1065_v53 }
 0x2a9   : > { %1571 = vmatpush1.bf16.msra.mxu1 %v1565_v17  ;;  %1602 = vmatprep.mubr.bf16.mxu1 %v1932_v7 }
 0x2b4   : > { %1750 = vmatmul.mubr.msk.bf16.vlgmr.msra.gmra.mrb[0].mxu1 %vm371_vm10, %v1066_v52 }
 0x387   : > { %v1604_v60 = vpop.f32.mrb[0].mxu1 }
 0x388   : > { %v1622_v38 = vsub.f32 %v1604_v60, %v1620_v19  ;;  %v1606_v61 = vpop.f32.mrb[1].mxu1 }
 0x389   : > { %v1623_v62 = vsub.f32 %v1606_v61, %v1620_v19  ;;  %v1608_v63 = vpop.f32.mrb[2].mxu1 }
 0x38a   : > { %v1631_v3 = vmul.f32 %v1629_v58, %v1622_v38  ;;  %v1609_v4 = vpop.f32.mrb[3].mxu1 }
 0x38b   : > { %v1632_v6 = vmul.f32 %v1629_v58, %v1623_v62 }
 0x38c   : > { %v1638_v7 = vmul.f32 %v1636_v8, %v1631_v3 }
 0x38d   : > { %v1639_v11 = vmul.f32 %v1636_v8, %v1632_v6 }
 0x38e   : > { %v1645_v2 = vadd.f32 %v1643_v35, %v1638_v7 }
 0x38f   : > { %v1646_v12 = vadd.f32 %v1643_v35, %v1639_v11 }
 0x390   : > { %v1647_v13 = vadd.f32 %v1645_v2, %v1992_v0 }
 0x391   : > { %v1648_v14 = vadd.f32 %v1646_v12, %v1994_v1 }
 0x392   : > { %1649 = vst [vmem:[%s251_s30] sm:$0xff] %v1647_v13 }
 0x393   : > { %1650 = vst [vmem:[%s251_s30 + $0x8] sm:$0xff] %v1648_v14 }
 0x394 PF: > { %s16_s21 = sadd.s32 1, %s1929_s21  }
 0x395   : > { %p13_p4 = scmp.ge.s32.totalorder %s16_s21, 4  }
 0x397   :  { %15 = sbr.rel (!%p13_p4) target bundleno = 1 (0x1), region = 74 }

</bundles_post_ra>
